<compile_context>
chip_gen: v7x
topology: tpu7x:2x2x1
jax: 0.10.0
libtpu: 0.0.40
codegen_flags: <defaults>
</compile_context>

<pallas_src>
import functools
import math

import jax
import jax.numpy as jnp
import numpy as np
from jax import lax
from jax.experimental import pallas as pl
from jax.experimental.pallas import tpu as pltpu


def _round_up(x, m):
    return ((x + m - 1) // m) * m


# ---------------------------------------------------------------------------
# Fused forward kernel (whole network, one grid step per batch tile)
# ---------------------------------------------------------------------------
def _make_analyzer_kernel(H0, W0, depth, C, B, out_channels, negative_slope,
                          matmul_dtype):

    def _shift(x, off):
        """result[:, p] = x[:, p + off]; boundary lanes are don't-care filler
        (every lane that would need the filler is fixed by a reflect mask or is
        an odd-position lane that the pooling decimation never reads)."""
        L = x.shape[1]
        if off == 0:
            return x
        if off > 0:
            return jnp.concatenate([x[:, off:], x[:, L - off:]], axis=1)
        k = -off
        return jnp.concatenate([x[:, :k], x[:, :L - k]], axis=1)

    def _conv3x3(a, w_ref, w_idx, W, fc, lc, fr, lr, apply_lrelu):
        """Reflect-pad 3x3 conv on a (C, L) activation (L = B*H*W)."""
        # W-direction taps (reflection via column masks)
        am1 = _shift(a, -1)   # a[p-1]
        ap1 = _shift(a, +1)   # a[p+1]
        wvars = (jnp.where(fc, ap1, am1),   # dw = -1 (kw = 0)
                 a,                         # dw =  0 (kw = 1)
                 jnp.where(lc, am1, ap1))   # dw = +1 (kw = 2)
        # H-direction taps (reflection via row masks), on each W-variant
        taps = [[None] * 3 for _ in range(3)]
        for kw, xv in enumerate(wvars):
            xm = _shift(xv, -W)             # row h-1
            xp = _shift(xv, +W)             # row h+1
            taps[0][kw] = jnp.where(fr, xp, xm)   # dh = -1
            taps[1][kw] = xv                       # dh =  0
            taps[2][kw] = jnp.where(lr, xm, xp)   # dh = +1
        # single packed matmul: (C, 9C) @ (9C, L)
        slab = jnp.concatenate(
            [taps[kh][kw] for kh in range(3) for kw in range(3)], axis=0)
        wmat = w_ref[w_idx]
        acc = jnp.dot(wmat.astype(matmul_dtype), slab.astype(matmul_dtype),
                      preferred_element_type=jnp.float32)
        if apply_lrelu:
            acc = jnp.where(acc >= 0.0, acc, negative_slope * acc)
        return acc

    def _maxpool2x2(a, H, W):
        """MaxPool2d(2,2) on (C, B*H*W) -> (C, B*(H/2)*(W/2)), all O(C*P)."""
        rm = jnp.maximum(a, _shift(a, W))            # row-pair max (even h valid)
        # gather coarse rows: one (C, W) chunk per (image, even row)
        chunks = []
        for b in range(B):
            for hh in range(H // 2):
                s = b * H * W + 2 * hh * W
                chunks.append(rm[:, s:s + W])
        big = jnp.concatenate(chunks, axis=0)        # (C*B*H/2, W)
        cm = jnp.maximum(big, _shift(big, 1))        # col-pair max (even w valid)
        # tiny even-column selector, generated in-kernel (no O(P^2) operand)
        sel = (lax.broadcasted_iota(jnp.int32, (W, W // 2), 0) ==
               2 * lax.broadcasted_iota(jnp.int32, (W, W // 2), 1)
               ).astype(jnp.float32)
        dec = jnp.dot(cm, sel, preferred_element_type=jnp.float32)   # (C*B*H/2, W/2)
        # reassemble the flat image-major (C, B*(H/2)*(W/2)) layout
        pieces = [dec[i * C:(i + 1) * C, :] for i in range(B * (H // 2))]
        return jnp.concatenate(pieces, axis=1)

    def kernel(x_ref, w_ref, mask_ref, *out_refs):
        a = x_ref[0].astype(jnp.float32)             # (C, B*H0*W0)
        H, W = H0, W0
        widx = 0
        for lvl in range(depth + 1):
            L = B * H * W
            mk = mask_ref[lvl]                       # (4, L0), hoisted per level
            fc = mk[0:1, :L] > 0.5                   # w == 0
            lc = mk[1:2, :L] > 0.5                   # w == W-1
            fr = mk[2:3, :L] > 0.5                   # h == 0
            lr = mk[3:4, :L] > 0.5                   # h == H-1
            n_convs = 3 if lvl == 0 else 2           # embedding vs DownsamplingUnit
            for _ in range(n_convs):
                a = _conv3x3(a, w_ref, widx, W, fc, lc, fr, lr,
                             apply_lrelu=(lvl > 0))
                widx += 1
            # bridge l (l < depth) / final fx (l == depth)
            out_refs[lvl][0] = a[:out_channels[lvl]].astype(out_refs[lvl].dtype)
            if lvl < depth:
                a = _maxpool2x2(a, H, W)
                H, W = H // 2, W // 2

    return kernel


# ---------------------------------------------------------------------------
# Wrapper
# ---------------------------------------------------------------------------
@functools.partial(jax.jit,
                   static_argnames=("negative_slope", "batch_tile",
                                    "matmul_dtype"))
def analyzer_forward(x_nchw, embedding_w, track_w, negative_slope=0.01,
                     batch_tile=None, matmul_dtype=jnp.float32):
    """Pallas forward of Analyzer; returns (fx, fx_brg_list) in NCHW like PyTorch."""
    N, c_org, H0, W0 = x_nchw.shape
    depth = len(track_w)
    assert H0 % (1 << depth) == 0 and W0 % (1 << depth) == 0
    assert (H0 >> depth) >= 2 and (W0 >> depth) >= 2   # reflect pad needs >= 2

    # batch tile: concat B images along lanes; keep grid >= 2 (v7x has 2 TCs)
    if batch_tile is None:
        batch_tile = N // 2 if (N >= 4 and N % 2 == 0) else 1
    assert N % batch_tile == 0
    B = batch_tile
    G = N // B

    w_hwio = list(embedding_w) + [w for pair in track_w for w in pair]
    ch_all = [int(w.shape[2]) for w in w_hwio] + [int(w.shape[3]) for w in w_hwio]
    C = max(8, _round_up(max(ch_all + [c_org]), 8))
    out_channels = tuple([int(embedding_w[-1].shape[3])]
                         + [int(track_w[d][1].shape[3]) for d in range(depth)])

    Hs = [H0 >> l for l in range(depth + 1)]
    Ws = [W0 >> l for l in range(depth + 1)]
    Ps = [Hs[l] * Ws[l] for l in range(depth + 1)]
    P0 = Ps[0]
    L0 = B * P0

    # reflect-padding row/column masks, one (4, L0) slab per level (host consts)
    masks = np.zeros((depth + 1, 4, L0), np.float32)
    for l in range(depth + 1):
        Hl, Wl, Pl = Hs[l], Ws[l], Ps[l]
        p = np.arange(B * Pl) % Pl
        wq, hq = p % Wl, p // Wl
        masks[l, 0, :B * Pl] = (wq == 0)
        masks[l, 1, :B * Pl] = (wq == Wl - 1)
        masks[l, 2, :B * Pl] = (hq == 0)
        masks[l, 3, :B * Pl] = (hq == Hl - 1)
    masks = jnp.asarray(masks)

    # pack all conv weights into one (n_w, C, 9C) operand;
    # packed[o, (kh*3+kw)*C + c] = w_hwio[kh, kw, c, o]
    def _pack(w):
        cin, cout = int(w.shape[2]), int(w.shape[3])
        wt = jnp.transpose(w, (3, 0, 1, 2))                      # (cout,3,3,cin)
        wt = jnp.pad(wt, ((0, C - cout), (0, 0), (0, 0), (0, C - cin)))
        return jnp.reshape(wt, (C, 9 * C))
    w_all = jnp.stack([_pack(w) for w in w_hwio], axis=0)

    # input: (N, c, H, W) -> (G, C, B*P0), image-major along lanes
    xp = jnp.pad(x_nchw, ((0, 0), (0, C - c_org), (0, 0), (0, 0)))
    x_op = jnp.transpose(jnp.reshape(xp, (G, B, C, P0)), (0, 2, 1, 3))
    x_op = jnp.reshape(x_op, (G, C, L0))

    in_specs = [
        pl.BlockSpec((1, C, L0), lambda g: (g, 0, 0)),
        pl.BlockSpec(w_all.shape, lambda g: (0, 0, 0)),
        pl.BlockSpec(masks.shape, lambda g: (0, 0, 0)),
    ]
    out_shape = tuple(
        jax.ShapeDtypeStruct((G, out_channels[l], B * Ps[l]), x_nchw.dtype)
        for l in range(depth + 1))
    out_specs = tuple(
        pl.BlockSpec((1, out_channels[l], B * Ps[l]), lambda g: (g, 0, 0))
        for l in range(depth + 1))

    # VMEM budget: double-buffered IO blocks + weights/masks + working set
    act_b = C * L0 * 4
    io_b = 2 * 4 * (C * L0 + sum(out_channels[l] * B * Ps[l]
                                 for l in range(depth + 1)))
    est = int(io_b + w_all.size * 4 + masks.size * 4 + 16 * act_b + (1 << 20))
    vmem_limit = int(min(64 * 2 ** 20, max(16 * 2 ** 20, est)))

    kernel = _make_analyzer_kernel(H0, W0, depth, C, B, out_channels,
                                   negative_slope, matmul_dtype)

    outs = pl.pallas_call(
        kernel,
        grid=(G,),
        in_specs=in_specs,
        out_specs=out_specs,
        out_shape=out_shape,
        compiler_params=pltpu.CompilerParams(
            dimension_semantics=("parallel",),
            vmem_limit_bytes=vmem_limit),
    )(x_op, w_all, masks)

    # free wrapper reshapes back to NCHW
    results = []
    for l in range(depth + 1):
        o = jnp.reshape(outs[l], (G, out_channels[l], B, Ps[l]))
        o = jnp.transpose(o, (0, 2, 1, 3))
        results.append(jnp.reshape(o, (N, out_channels[l], Hs[l], Ws[l])))
    return results[depth], results[:depth]


# ---------------------------------------------------------------------------
# Pure-JAX reference (for validation only)
# ---------------------------------------------------------------------------
def _reference_forward(x, embedding_w, track_w, negative_slope=0.01):
    dn = ("NCHW", "HWIO", "NCHW")

    def conv(a, w):
        ap = jnp.pad(a, ((0, 0), (0, 0), (1, 1), (1, 1)), mode="reflect")
        return jax.lax.conv_general_dilated(
            ap, w, (1, 1), "VALID", dimension_numbers=dn,
            precision=jax.lax.Precision.HIGHEST)

    def pool(a):
        return jax.lax.reduce_window(a, -jnp.inf, jax.lax.max,
                                     (1, 1, 2, 2), (1, 1, 2, 2), "VALID")

    def lrelu(a):
        return jnp.where(a >= 0, a, negative_slope * a)

    fx = x
    for w in embedding_w:
        fx = conv(fx, w)
    brgs = []
    for (w1, w2) in track_w:
        brgs.append(fx)
        fx = lrelu(conv(pool(fx), w1))
        fx = lrelu(conv(fx, w2))
    return fx, brgs


# ---------------------------------------------------------------------------
# Parameter init (deterministic, xavier_normal_ like initialize_weights)
# ---------------------------------------------------------------------------
def _xavier_normal(key, cin, cout):
    fan_in, fan_out = cin * 9, cout * 9
    std = math.sqrt(2.0 / (fan_in + fan_out))
    return std * jax.random.normal(key, (3, 3, cin, cout), dtype=jnp.float32)


def init_analyzer_params(key, channels_org=3, channels_net=8, depth=3,
                         channels_expansion=1):
    keys = jax.random.split(key, 3 + 2 * depth)
    embedding = [
        _xavier_normal(keys[0], channels_org, channels_net),
        _xavier_normal(keys[1], channels_net, channels_net),
        _xavier_normal(keys[2], channels_net, channels_net),
    ]
    track = []
    for i in range(depth):
        cin = channels_net * channels_expansion ** i
        cout = channels_net * channels_expansion ** (i + 1)
        track.append((
            _xavier_normal(keys[3 + 2 * i], cin, cin),
            _xavier_normal(keys[4 + 2 * i], cin, cout),
        ))
    return embedding, track


# ---------------------------------------------------------------------------
if __name__ == "__main__":
    key = jax.random.PRNGKey(0)
    kparams, kx = jax.random.split(key)

    channels_org, channels_net, depth = 3, 8, 3
    embedding_w, track_w = init_analyzer_params(
        kparams, channels_org=channels_org, channels_net=channels_net, depth=depth)

    # small deterministic input, PyTorch NCHW convention
    x = jax.random.normal(kx, (2, channels_org, 16, 16), dtype=jnp.float32)

    fx, fx_brg_list = analyzer_forward(x, embedding_w, track_w,
                                       negative_slope=0.01)
    fx = jax.block_until_ready(fx)
    fx_brg_list = [jax.block_until_ready(b) for b in fx_brg_list]

    # shapes implied by the module defaults (three 2x halvings of 16x16)
    assert fx.shape == (2, channels_net, 2, 2), fx.shape
    expected_brg = [(2, channels_net, 16, 16), (2, channels_net, 8, 8),
                    (2, channels_net, 4, 4)]
    assert [b.shape for b in fx_brg_list] == expected_brg, \
        [b.shape for b in fx_brg_list]
    assert all(bool(jnp.all(jnp.isfinite(b))) for b in [fx] + fx_brg_list)

    # numerical check against a pure-JAX reference of the same module
    fx_ref, brg_ref = _reference_forward(x, embedding_w, track_w, 0.01)
    np.testing.assert_allclose(np.asarray(fx), np.asarray(fx_ref),
                               rtol=3e-2, atol=3e-2)
    for b, br in zip(fx_brg_list, brg_ref):
        np.testing.assert_allclose(np.asarray(b), np.asarray(br),
                                   rtol=3e-2, atol=3e-2)

    print("KERNEL_OK")
</pallas_src>

<mosaic_0001>
module attributes {stable_mosaic.version = 11 : i64} {
  func.func @kernel(%arg0: i32, %arg1: memref<1x8x256xf32, #tpu.memory_space<vmem>>, %arg2: memref<9x8x72xf32, #tpu.memory_space<vmem>>, %arg3: memref<4x4x256xf32, #tpu.memory_space<vmem>>, %arg4: memref<1x8x256xf32, #tpu.memory_space<vmem>>, %arg5: memref<1x8x64xf32, #tpu.memory_space<vmem>>, %arg6: memref<1x8x16xf32, #tpu.memory_space<vmem>>, %arg7: memref<1x8x4xf32, #tpu.memory_space<vmem>>) attributes {dimension_semantics = [#tpu.dimension_semantics<parallel>], iteration_bounds = array<i64: 2>, scalar_prefetch = 0 : i64, scratch_operands = 0 : i64, tpu.core_type = #tpu.core_type<tc>, window_params = [{transform_indices = @transform_0, window_bounds = array<i64: 1, 8, 256>}, {pipeline_mode = #tpu.pipeline_mode<synchronous>, transform_indices = @transform_1, window_bounds = array<i64: 9, 8, 72>}, {pipeline_mode = #tpu.pipeline_mode<synchronous>, transform_indices = @transform_2, window_bounds = array<i64: 4, 4, 256>}, {transform_indices = @transform_3, window_bounds = array<i64: 1, 8, 256>}, {transform_indices = @transform_4, window_bounds = array<i64: 1, 8, 64>}, {transform_indices = @transform_5, window_bounds = array<i64: 1, 8, 16>}, {transform_indices = @transform_6, window_bounds = array<i64: 1, 8, 4>}]} {
    %c0 = arith.constant 0 : index
    %c0_0 = arith.constant 0 : index
    %c0_1 = arith.constant 0 : index
    %0 = vector.load %arg1[%c0, %c0_0, %c0_1] : memref<1x8x256xf32, #tpu.memory_space<vmem>>, vector<1x8x256xf32>
    %1 = vector.shape_cast %0 : vector<1x8x256xf32> to vector<8x256xf32>
    %c0_2 = arith.constant 0 : index
    %c0_3 = arith.constant 0 : index
    %c0_4 = arith.constant 0 : index
    %2 = vector.load %arg3[%c0_2, %c0_3, %c0_4] : memref<4x4x256xf32, #tpu.memory_space<vmem>>, vector<1x4x256xf32>
    %3 = vector.shape_cast %2 : vector<1x4x256xf32> to vector<4x256xf32>
    %4 = vector.extract_strided_slice %3 {offsets = [0, 0], sizes = [1, 256], strides = [1, 1]} : vector<4x256xf32> to vector<1x256xf32>
    %cst = arith.constant 5.000000e-01 : f32
    %5 = vector.broadcast %cst : f32 to vector<1x256xf32>
    %6 = arith.cmpf ogt, %4, %5 : vector<1x256xf32>
    %7 = vector.extract_strided_slice %3 {offsets = [1, 0], sizes = [1, 256], strides = [1, 1]} : vector<4x256xf32> to vector<1x256xf32>
    %cst_5 = arith.constant 5.000000e-01 : f32
    %8 = vector.broadcast %cst_5 : f32 to vector<1x256xf32>
    %9 = arith.cmpf ogt, %7, %8 : vector<1x256xf32>
    %10 = vector.extract_strided_slice %3 {offsets = [2, 0], sizes = [1, 256], strides = [1, 1]} : vector<4x256xf32> to vector<1x256xf32>
    %cst_6 = arith.constant 5.000000e-01 : f32
    %11 = vector.broadcast %cst_6 : f32 to vector<1x256xf32>
    %12 = arith.cmpf ogt, %10, %11 : vector<1x256xf32>
    %13 = vector.extract_strided_slice %3 {offsets = [3, 0], sizes = [1, 256], strides = [1, 1]} : vector<4x256xf32> to vector<1x256xf32>
    %cst_7 = arith.constant 5.000000e-01 : f32
    %14 = vector.broadcast %cst_7 : f32 to vector<1x256xf32>
    %15 = arith.cmpf ogt, %13, %14 : vector<1x256xf32>
    %16 = vector.extract_strided_slice %1 {offsets = [0, 0], sizes = [8, 1], strides = [1, 1]} : vector<8x256xf32> to vector<8x1xf32>
    %17 = vector.extract_strided_slice %1 {offsets = [0, 0], sizes = [8, 255], strides = [1, 1]} : vector<8x256xf32> to vector<8x255xf32>
    %18 = tpu.concatenate %16, %17 in 1 : vector<8x1xf32>, vector<8x255xf32> -> vector<8x256xf32>
    %19 = vector.extract_strided_slice %1 {offsets = [0, 1], sizes = [8, 255], strides = [1, 1]} : vector<8x256xf32> to vector<8x255xf32>
    %20 = vector.extract_strided_slice %1 {offsets = [0, 255], sizes = [8, 1], strides = [1, 1]} : vector<8x256xf32> to vector<8x1xf32>
    %21 = tpu.concatenate %19, %20 in 1 : vector<8x255xf32>, vector<8x1xf32> -> vector<8x256xf32>
    %22 = vector.shape_cast %6 : vector<1x256xi1> to vector<1x256xi1>
    %23 = vector.broadcast %22 : vector<1x256xi1> to vector<8x256xi1>
    %24 = arith.select %23, %21, %18 : vector<8x256xi1>, vector<8x256xf32>
    %25 = vector.shape_cast %9 : vector<1x256xi1> to vector<1x256xi1>
    %26 = vector.broadcast %25 : vector<1x256xi1> to vector<8x256xi1>
    %27 = arith.select %26, %18, %21 : vector<8x256xi1>, vector<8x256xf32>
    %28 = vector.extract_strided_slice %24 {offsets = [0, 0], sizes = [8, 16], strides = [1, 1]} : vector<8x256xf32> to vector<8x16xf32>
    %29 = vector.extract_strided_slice %24 {offsets = [0, 0], sizes = [8, 240], strides = [1, 1]} : vector<8x256xf32> to vector<8x240xf32>
    %30 = tpu.concatenate %28, %29 in 1 : vector<8x16xf32>, vector<8x240xf32> -> vector<8x256xf32>
    %31 = vector.extract_strided_slice %24 {offsets = [0, 16], sizes = [8, 240], strides = [1, 1]} : vector<8x256xf32> to vector<8x240xf32>
    %32 = vector.extract_strided_slice %24 {offsets = [0, 240], sizes = [8, 16], strides = [1, 1]} : vector<8x256xf32> to vector<8x16xf32>
    %33 = tpu.concatenate %31, %32 in 1 : vector<8x240xf32>, vector<8x16xf32> -> vector<8x256xf32>
    %34 = vector.shape_cast %12 : vector<1x256xi1> to vector<1x256xi1>
    %35 = vector.broadcast %34 : vector<1x256xi1> to vector<8x256xi1>
    %36 = arith.select %35, %33, %30 : vector<8x256xi1>, vector<8x256xf32>
    %37 = vector.shape_cast %15 : vector<1x256xi1> to vector<1x256xi1>
    %38 = vector.broadcast %37 : vector<1x256xi1> to vector<8x256xi1>
    %39 = arith.select %38, %30, %33 : vector<8x256xi1>, vector<8x256xf32>
    %40 = vector.extract_strided_slice %1 {offsets = [0, 0], sizes = [8, 16], strides = [1, 1]} : vector<8x256xf32> to vector<8x16xf32>
    %41 = vector.extract_strided_slice %1 {offsets = [0, 0], sizes = [8, 240], strides = [1, 1]} : vector<8x256xf32> to vector<8x240xf32>
    %42 = tpu.concatenate %40, %41 in 1 : vector<8x16xf32>, vector<8x240xf32> -> vector<8x256xf32>
    %43 = vector.extract_strided_slice %1 {offsets = [0, 16], sizes = [8, 240], strides = [1, 1]} : vector<8x256xf32> to vector<8x240xf32>
    %44 = vector.extract_strided_slice %1 {offsets = [0, 240], sizes = [8, 16], strides = [1, 1]} : vector<8x256xf32> to vector<8x16xf32>
    %45 = tpu.concatenate %43, %44 in 1 : vector<8x240xf32>, vector<8x16xf32> -> vector<8x256xf32>
    %46 = vector.shape_cast %12 : vector<1x256xi1> to vector<1x256xi1>
    %47 = vector.broadcast %46 : vector<1x256xi1> to vector<8x256xi1>
    %48 = arith.select %47, %45, %42 : vector<8x256xi1>, vector<8x256xf32>
    %49 = vector.shape_cast %15 : vector<1x256xi1> to vector<1x256xi1>
    %50 = vector.broadcast %49 : vector<1x256xi1> to vector<8x256xi1>
    %51 = arith.select %50, %42, %45 : vector<8x256xi1>, vector<8x256xf32>
    %52 = vector.extract_strided_slice %27 {offsets = [0, 0], sizes = [8, 16], strides = [1, 1]} : vector<8x256xf32> to vector<8x16xf32>
    %53 = vector.extract_strided_slice %27 {offsets = [0, 0], sizes = [8, 240], strides = [1, 1]} : vector<8x256xf32> to vector<8x240xf32>
    %54 = tpu.concatenate %52, %53 in 1 : vector<8x16xf32>, vector<8x240xf32> -> vector<8x256xf32>
    %55 = vector.extract_strided_slice %27 {offsets = [0, 16], sizes = [8, 240], strides = [1, 1]} : vector<8x256xf32> to vector<8x240xf32>
    %56 = vector.extract_strided_slice %27 {offsets = [0, 240], sizes = [8, 16], strides = [1, 1]} : vector<8x256xf32> to vector<8x16xf32>
    %57 = tpu.concatenate %55, %56 in 1 : vector<8x240xf32>, vector<8x16xf32> -> vector<8x256xf32>
    %58 = vector.shape_cast %12 : vector<1x256xi1> to vector<1x256xi1>
    %59 = vector.broadcast %58 : vector<1x256xi1> to vector<8x256xi1>
    %60 = arith.select %59, %57, %54 : vector<8x256xi1>, vector<8x256xf32>
    %61 = vector.shape_cast %15 : vector<1x256xi1> to vector<1x256xi1>
    %62 = vector.broadcast %61 : vector<1x256xi1> to vector<8x256xi1>
    %63 = arith.select %62, %54, %57 : vector<8x256xi1>, vector<8x256xf32>
    %64 = tpu.concatenate %36, %48, %60, %24, %1, %27, %39, %51, %63 in 0 : vector<8x256xf32>, vector<8x256xf32>, vector<8x256xf32>, vector<8x256xf32>, vector<8x256xf32>, vector<8x256xf32>, vector<8x256xf32>, vector<8x256xf32>, vector<8x256xf32> -> vector<72x256xf32>
    %c0_8 = arith.constant 0 : index
    %c0_9 = arith.constant 0 : index
    %c0_10 = arith.constant 0 : index
    %65 = vector.load %arg2[%c0_8, %c0_9, %c0_10] : memref<9x8x72xf32, #tpu.memory_space<vmem>>, vector<1x8x72xf32>
    %66 = vector.shape_cast %65 : vector<1x8x72xf32> to vector<8x72xf32>
    %cst_11 = arith.constant dense<0.000000e+00> : vector<8x256xf32>
    %67 = tpu.matmul %66, %64, %cst_11 {dimension_numbers = #tpu.dot_dimension_numbers<[1], [0], [0], [1], [0, 0, 1, 1], [], []>} : vector<8x72xf32>, vector<72x256xf32>, vector<8x256xf32> -> vector<8x256xf32>
    %68 = vector.extract_strided_slice %67 {offsets = [0, 0], sizes = [8, 1], strides = [1, 1]} : vector<8x256xf32> to vector<8x1xf32>
    %69 = vector.extract_strided_slice %67 {offsets = [0, 0], sizes = [8, 255], strides = [1, 1]} : vector<8x256xf32> to vector<8x255xf32>
    %70 = tpu.concatenate %68, %69 in 1 : vector<8x1xf32>, vector<8x255xf32> -> vector<8x256xf32>
    %71 = vector.extract_strided_slice %67 {offsets = [0, 1], sizes = [8, 255], strides = [1, 1]} : vector<8x256xf32> to vector<8x255xf32>
    %72 = vector.extract_strided_slice %67 {offsets = [0, 255], sizes = [8, 1], strides = [1, 1]} : vector<8x256xf32> to vector<8x1xf32>
    %73 = tpu.concatenate %71, %72 in 1 : vector<8x255xf32>, vector<8x1xf32> -> vector<8x256xf32>
    %74 = vector.shape_cast %6 : vector<1x256xi1> to vector<1x256xi1>
    %75 = vector.broadcast %74 : vector<1x256xi1> to vector<8x256xi1>
    %76 = arith.select %75, %73, %70 : vector<8x256xi1>, vector<8x256xf32>
    %77 = vector.shape_cast %9 : vector<1x256xi1> to vector<1x256xi1>
    %78 = vector.broadcast %77 : vector<1x256xi1> to vector<8x256xi1>
    %79 = arith.select %78, %70, %73 : vector<8x256xi1>, vector<8x256xf32>
    %80 = vector.extract_strided_slice %76 {offsets = [0, 0], sizes = [8, 16], strides = [1, 1]} : vector<8x256xf32> to vector<8x16xf32>
    %81 = vector.extract_strided_slice %76 {offsets = [0, 0], sizes = [8, 240], strides = [1, 1]} : vector<8x256xf32> to vector<8x240xf32>
    %82 = tpu.concatenate %80, %81 in 1 : vector<8x16xf32>, vector<8x240xf32> -> vector<8x256xf32>
    %83 = vector.extract_strided_slice %76 {offsets = [0, 16], sizes = [8, 240], strides = [1, 1]} : vector<8x256xf32> to vector<8x240xf32>
    %84 = vector.extract_strided_slice %76 {offsets = [0, 240], sizes = [8, 16], strides = [1, 1]} : vector<8x256xf32> to vector<8x16xf32>
    %85 = tpu.concatenate %83, %84 in 1 : vector<8x240xf32>, vector<8x16xf32> -> vector<8x256xf32>
    %86 = vector.shape_cast %12 : vector<1x256xi1> to vector<1x256xi1>
    %87 = vector.broadcast %86 : vector<1x256xi1> to vector<8x256xi1>
    %88 = arith.select %87, %85, %82 : vector<8x256xi1>, vector<8x256xf32>
    %89 = vector.shape_cast %15 : vector<1x256xi1> to vector<1x256xi1>
    %90 = vector.broadcast %89 : vector<1x256xi1> to vector<8x256xi1>
    %91 = arith.select %90, %82, %85 : vector<8x256xi1>, vector<8x256xf32>
    %92 = vector.extract_strided_slice %67 {offsets = [0, 0], sizes = [8, 16], strides = [1, 1]} : vector<8x256xf32> to vector<8x16xf32>
    %93 = vector.extract_strided_slice %67 {offsets = [0, 0], sizes = [8, 240], strides = [1, 1]} : vector<8x256xf32> to vector<8x240xf32>
    %94 = tpu.concatenate %92, %93 in 1 : vector<8x16xf32>, vector<8x240xf32> -> vector<8x256xf32>
    %95 = vector.extract_strided_slice %67 {offsets = [0, 16], sizes = [8, 240], strides = [1, 1]} : vector<8x256xf32> to vector<8x240xf32>
    %96 = vector.extract_strided_slice %67 {offsets = [0, 240], sizes = [8, 16], strides = [1, 1]} : vector<8x256xf32> to vector<8x16xf32>
    %97 = tpu.concatenate %95, %96 in 1 : vector<8x240xf32>, vector<8x16xf32> -> vector<8x256xf32>
    %98 = vector.shape_cast %12 : vector<1x256xi1> to vector<1x256xi1>
    %99 = vector.broadcast %98 : vector<1x256xi1> to vector<8x256xi1>
    %100 = arith.select %99, %97, %94 : vector<8x256xi1>, vector<8x256xf32>
    %101 = vector.shape_cast %15 : vector<1x256xi1> to vector<1x256xi1>
    %102 = vector.broadcast %101 : vector<1x256xi1> to vector<8x256xi1>
    %103 = arith.select %102, %94, %97 : vector<8x256xi1>, vector<8x256xf32>
    %104 = vector.extract_strided_slice %79 {offsets = [0, 0], sizes = [8, 16], strides = [1, 1]} : vector<8x256xf32> to vector<8x16xf32>
    %105 = vector.extract_strided_slice %79 {offsets = [0, 0], sizes = [8, 240], strides = [1, 1]} : vector<8x256xf32> to vector<8x240xf32>
    %106 = tpu.concatenate %104, %105 in 1 : vector<8x16xf32>, vector<8x240xf32> -> vector<8x256xf32>
    %107 = vector.extract_strided_slice %79 {offsets = [0, 16], sizes = [8, 240], strides = [1, 1]} : vector<8x256xf32> to vector<8x240xf32>
    %108 = vector.extract_strided_slice %79 {offsets = [0, 240], sizes = [8, 16], strides = [1, 1]} : vector<8x256xf32> to vector<8x16xf32>
    %109 = tpu.concatenate %107, %108 in 1 : vector<8x240xf32>, vector<8x16xf32> -> vector<8x256xf32>
    %110 = vector.shape_cast %12 : vector<1x256xi1> to vector<1x256xi1>
    %111 = vector.broadcast %110 : vector<1x256xi1> to vector<8x256xi1>
    %112 = arith.select %111, %109, %106 : vector<8x256xi1>, vector<8x256xf32>
    %113 = vector.shape_cast %15 : vector<1x256xi1> to vector<1x256xi1>
    %114 = vector.broadcast %113 : vector<1x256xi1> to vector<8x256xi1>
    %115 = arith.select %114, %106, %109 : vector<8x256xi1>, vector<8x256xf32>
    %116 = tpu.concatenate %88, %100, %112, %76, %67, %79, %91, %103, %115 in 0 : vector<8x256xf32>, vector<8x256xf32>, vector<8x256xf32>, vector<8x256xf32>, vector<8x256xf32>, vector<8x256xf32>, vector<8x256xf32>, vector<8x256xf32>, vector<8x256xf32> -> vector<72x256xf32>
    %c1 = arith.constant 1 : index
    %c0_12 = arith.constant 0 : index
    %c0_13 = arith.constant 0 : index
    %117 = vector.load %arg2[%c1, %c0_12, %c0_13] : memref<9x8x72xf32, #tpu.memory_space<vmem>>, vector<1x8x72xf32>
    %118 = vector.shape_cast %117 : vector<1x8x72xf32> to vector<8x72xf32>
    %cst_14 = arith.constant dense<0.000000e+00> : vector<8x256xf32>
    %119 = tpu.matmul %118, %116, %cst_14 {dimension_numbers = #tpu.dot_dimension_numbers<[1], [0], [0], [1], [0, 0, 1, 1], [], []>} : vector<8x72xf32>, vector<72x256xf32>, vector<8x256xf32> -> vector<8x256xf32>
    %120 = vector.extract_strided_slice %119 {offsets = [0, 0], sizes = [8, 1], strides = [1, 1]} : vector<8x256xf32> to vector<8x1xf32>
    %121 = vector.extract_strided_slice %119 {offsets = [0, 0], sizes = [8, 255], strides = [1, 1]} : vector<8x256xf32> to vector<8x255xf32>
    %122 = tpu.concatenate %120, %121 in 1 : vector<8x1xf32>, vector<8x255xf32> -> vector<8x256xf32>
    %123 = vector.extract_strided_slice %119 {offsets = [0, 1], sizes = [8, 255], strides = [1, 1]} : vector<8x256xf32> to vector<8x255xf32>
    %124 = vector.extract_strided_slice %119 {offsets = [0, 255], sizes = [8, 1], strides = [1, 1]} : vector<8x256xf32> to vector<8x1xf32>
    %125 = tpu.concatenate %123, %124 in 1 : vector<8x255xf32>, vector<8x1xf32> -> vector<8x256xf32>
    %126 = vector.shape_cast %6 : vector<1x256xi1> to vector<1x256xi1>
    %127 = vector.broadcast %126 : vector<1x256xi1> to vector<8x256xi1>
    %128 = arith.select %127, %125, %122 : vector<8x256xi1>, vector<8x256xf32>
    %129 = vector.shape_cast %9 : vector<1x256xi1> to vector<1x256xi1>
    %130 = vector.broadcast %129 : vector<1x256xi1> to vector<8x256xi1>
    %131 = arith.select %130, %122, %125 : vector<8x256xi1>, vector<8x256xf32>
    %132 = vector.extract_strided_slice %128 {offsets = [0, 0], sizes = [8, 16], strides = [1, 1]} : vector<8x256xf32> to vector<8x16xf32>
    %133 = vector.extract_strided_slice %128 {offsets = [0, 0], sizes = [8, 240], strides = [1, 1]} : vector<8x256xf32> to vector<8x240xf32>
    %134 = tpu.concatenate %132, %133 in 1 : vector<8x16xf32>, vector<8x240xf32> -> vector<8x256xf32>
    %135 = vector.extract_strided_slice %128 {offsets = [0, 16], sizes = [8, 240], strides = [1, 1]} : vector<8x256xf32> to vector<8x240xf32>
    %136 = vector.extract_strided_slice %128 {offsets = [0, 240], sizes = [8, 16], strides = [1, 1]} : vector<8x256xf32> to vector<8x16xf32>
    %137 = tpu.concatenate %135, %136 in 1 : vector<8x240xf32>, vector<8x16xf32> -> vector<8x256xf32>
    %138 = vector.shape_cast %12 : vector<1x256xi1> to vector<1x256xi1>
    %139 = vector.broadcast %138 : vector<1x256xi1> to vector<8x256xi1>
    %140 = arith.select %139, %137, %134 : vector<8x256xi1>, vector<8x256xf32>
    %141 = vector.shape_cast %15 : vector<1x256xi1> to vector<1x256xi1>
    %142 = vector.broadcast %141 : vector<1x256xi1> to vector<8x256xi1>
    %143 = arith.select %142, %134, %137 : vector<8x256xi1>, vector<8x256xf32>
    %144 = vector.extract_strided_slice %119 {offsets = [0, 0], sizes = [8, 16], strides = [1, 1]} : vector<8x256xf32> to vector<8x16xf32>
    %145 = vector.extract_strided_slice %119 {offsets = [0, 0], sizes = [8, 240], strides = [1, 1]} : vector<8x256xf32> to vector<8x240xf32>
    %146 = tpu.concatenate %144, %145 in 1 : vector<8x16xf32>, vector<8x240xf32> -> vector<8x256xf32>
    %147 = vector.extract_strided_slice %119 {offsets = [0, 16], sizes = [8, 240], strides = [1, 1]} : vector<8x256xf32> to vector<8x240xf32>
    %148 = vector.extract_strided_slice %119 {offsets = [0, 240], sizes = [8, 16], strides = [1, 1]} : vector<8x256xf32> to vector<8x16xf32>
    %149 = tpu.concatenate %147, %148 in 1 : vector<8x240xf32>, vector<8x16xf32> -> vector<8x256xf32>
    %150 = vector.shape_cast %12 : vector<1x256xi1> to vector<1x256xi1>
    %151 = vector.broadcast %150 : vector<1x256xi1> to vector<8x256xi1>
    %152 = arith.select %151, %149, %146 : vector<8x256xi1>, vector<8x256xf32>
    %153 = vector.shape_cast %15 : vector<1x256xi1> to vector<1x256xi1>
    %154 = vector.broadcast %153 : vector<1x256xi1> to vector<8x256xi1>
    %155 = arith.select %154, %146, %149 : vector<8x256xi1>, vector<8x256xf32>
    %156 = vector.extract_strided_slice %131 {offsets = [0, 0], sizes = [8, 16], strides = [1, 1]} : vector<8x256xf32> to vector<8x16xf32>
    %157 = vector.extract_strided_slice %131 {offsets = [0, 0], sizes = [8, 240], strides = [1, 1]} : vector<8x256xf32> to vector<8x240xf32>
    %158 = tpu.concatenate %156, %157 in 1 : vector<8x16xf32>, vector<8x240xf32> -> vector<8x256xf32>
    %159 = vector.extract_strided_slice %131 {offsets = [0, 16], sizes = [8, 240], strides = [1, 1]} : vector<8x256xf32> to vector<8x240xf32>
    %160 = vector.extract_strided_slice %131 {offsets = [0, 240], sizes = [8, 16], strides = [1, 1]} : vector<8x256xf32> to vector<8x16xf32>
    %161 = tpu.concatenate %159, %160 in 1 : vector<8x240xf32>, vector<8x16xf32> -> vector<8x256xf32>
    %162 = vector.shape_cast %12 : vector<1x256xi1> to vector<1x256xi1>
    %163 = vector.broadcast %162 : vector<1x256xi1> to vector<8x256xi1>
    %164 = arith.select %163, %161, %158 : vector<8x256xi1>, vector<8x256xf32>
    %165 = vector.shape_cast %15 : vector<1x256xi1> to vector<1x256xi1>
    %166 = vector.broadcast %165 : vector<1x256xi1> to vector<8x256xi1>
    %167 = arith.select %166, %158, %161 : vector<8x256xi1>, vector<8x256xf32>
    %168 = tpu.concatenate %140, %152, %164, %128, %119, %131, %143, %155, %167 in 0 : vector<8x256xf32>, vector<8x256xf32>, vector<8x256xf32>, vector<8x256xf32>, vector<8x256xf32>, vector<8x256xf32>, vector<8x256xf32>, vector<8x256xf32>, vector<8x256xf32> -> vector<72x256xf32>
    %c2 = arith.constant 2 : index
    %c0_15 = arith.constant 0 : index
    %c0_16 = arith.constant 0 : index
    %169 = vector.load %arg2[%c2, %c0_15, %c0_16] : memref<9x8x72xf32, #tpu.memory_space<vmem>>, vector<1x8x72xf32>
    %170 = vector.shape_cast %169 : vector<1x8x72xf32> to vector<8x72xf32>
    %cst_17 = arith.constant dense<0.000000e+00> : vector<8x256xf32>
    %171 = tpu.matmul %170, %168, %cst_17 {dimension_numbers = #tpu.dot_dimension_numbers<[1], [0], [0], [1], [0, 0, 1, 1], [], []>} : vector<8x72xf32>, vector<72x256xf32>, vector<8x256xf32> -> vector<8x256xf32>
    %c0_18 = arith.constant 0 : index
    %c0_19 = arith.constant 0 : index
    %c0_20 = arith.constant 0 : index
    %172 = vector.load %arg4[%c0_18, %c0_19, %c0_20] : memref<1x8x256xf32, #tpu.memory_space<vmem>>, vector<1x8x256xf32>
    %173 = vector.shape_cast %172 : vector<1x8x256xf32> to vector<8x256xf32>
    %174 = vector.shape_cast %171 : vector<8x256xf32> to vector<1x8x256xf32>
    tpu.vector_store %arg4[%c0_18, %c0_19, %c0_20], %174 {strides = array<i32>} : memref<1x8x256xf32, #tpu.memory_space<vmem>>, vector<1x8x256xf32>,
    %175 = vector.extract_strided_slice %171 {offsets = [0, 16], sizes = [8, 240], strides = [1, 1]} : vector<8x256xf32> to vector<8x240xf32>
    %176 = vector.extract_strided_slice %171 {offsets = [0, 240], sizes = [8, 16], strides = [1, 1]} : vector<8x256xf32> to vector<8x16xf32>
    %177 = tpu.concatenate %175, %176 in 1 : vector<8x240xf32>, vector<8x16xf32> -> vector<8x256xf32>
    %178 = arith.maximumf %171, %177 : vector<8x256xf32>
    %179 = vector.extract_strided_slice %178 {offsets = [0, 0], sizes = [8, 16], strides = [1, 1]} : vector<8x256xf32> to vector<8x16xf32>
    %180 = vector.extract_strided_slice %178 {offsets = [0, 32], sizes = [8, 16], strides = [1, 1]} : vector<8x256xf32> to vector<8x16xf32>
    %181 = vector.extract_strided_slice %178 {offsets = [0, 64], sizes = [8, 16], strides = [1, 1]} : vector<8x256xf32> to vector<8x16xf32>
    %182 = vector.extract_strided_slice %178 {offsets = [0, 96], sizes = [8, 16], strides = [1, 1]} : vector<8x256xf32> to vector<8x16xf32>
    %183 = vector.extract_strided_slice %178 {offsets = [0, 128], sizes = [8, 16], strides = [1, 1]} : vector<8x256xf32> to vector<8x16xf32>
    %184 = vector.extract_strided_slice %178 {offsets = [0, 160], sizes = [8, 16], strides = [1, 1]} : vector<8x256xf32> to vector<8x16xf32>
    %185 = vector.extract_strided_slice %178 {offsets = [0, 192], sizes = [8, 16], strides = [1, 1]} : vector<8x256xf32> to vector<8x16xf32>
    %186 = vector.extract_strided_slice %178 {offsets = [0, 224], sizes = [8, 16], strides = [1, 1]} : vector<8x256xf32> to vector<8x16xf32>
    %187 = tpu.concatenate %179, %180, %181, %182, %183, %184, %185, %186 in 0 : vector<8x16xf32>, vector<8x16xf32>, vector<8x16xf32>, vector<8x16xf32>, vector<8x16xf32>, vector<8x16xf32>, vector<8x16xf32>, vector<8x16xf32> -> vector<64x16xf32>
    %188 = vector.extract_strided_slice %187 {offsets = [0, 1], sizes = [64, 15], strides = [1, 1]} : vector<64x16xf32> to vector<64x15xf32>
    %189 = vector.extract_strided_slice %187 {offsets = [0, 15], sizes = [64, 1], strides = [1, 1]} : vector<64x16xf32> to vector<64x1xf32>
    %190 = tpu.concatenate %188, %189 in 1 : vector<64x15xf32>, vector<64x1xf32> -> vector<64x16xf32>
    %191 = arith.maximumf %187, %190 : vector<64x16xf32>
    %192 = tpu.iota {dimensions = array<i32: 0>} : vector<16x8xi32>
    %193 = tpu.iota {dimensions = array<i32: 1>} : vector<16x8xi32>
    %c2_i32 = arith.constant 2 : i32
    %194 = vector.broadcast %c2_i32 : i32 to vector<16x8xi32>
    %195 = arith.muli %194, %193 : vector<16x8xi32>
    %196 = arith.cmpi eq, %192, %195 : vector<16x8xi32>
    %197 = arith.extui %196 : vector<16x8xi1> to vector<16x8xi32>
    %198 = arith.sitofp %197 : vector<16x8xi32> to vector<16x8xf32>
    %cst_21 = arith.constant dense<0.000000e+00> : vector<64x8xf32>
    %199 = tpu.matmul %191, %198, %cst_21 {dimension_numbers = #tpu.dot_dimension_numbers<[1], [0], [0], [1], [0, 0, 1, 1], [], []>} : vector<64x16xf32>, vector<16x8xf32>, vector<64x8xf32> -> vector<64x8xf32>
    %200 = vector.extract_strided_slice %199 {offsets = [0, 0], sizes = [8, 8], strides = [1, 1]} : vector<64x8xf32> to vector<8x8xf32>
    %201 = vector.extract_strided_slice %199 {offsets = [8, 0], sizes = [8, 8], strides = [1, 1]} : vector<64x8xf32> to vector<8x8xf32>
    %202 = vector.extract_strided_slice %199 {offsets = [16, 0], sizes = [8, 8], strides = [1, 1]} : vector<64x8xf32> to vector<8x8xf32>
    %203 = vector.extract_strided_slice %199 {offsets = [24, 0], sizes = [8, 8], strides = [1, 1]} : vector<64x8xf32> to vector<8x8xf32>
    %204 = vector.extract_strided_slice %199 {offsets = [32, 0], sizes = [8, 8], strides = [1, 1]} : vector<64x8xf32> to vector<8x8xf32>
    %205 = vector.extract_strided_slice %199 {offsets = [40, 0], sizes = [8, 8], strides = [1, 1]} : vector<64x8xf32> to vector<8x8xf32>
    %206 = vector.extract_strided_slice %199 {offsets = [48, 0], sizes = [8, 8], strides = [1, 1]} : vector<64x8xf32> to vector<8x8xf32>
    %207 = vector.extract_strided_slice %199 {offsets = [56, 0], sizes = [8, 8], strides = [1, 1]} : vector<64x8xf32> to vector<8x8xf32>
    %208 = tpu.concatenate %200, %201, %202, %203, %204, %205, %206, %207 in 1 : vector<8x8xf32>, vector<8x8xf32>, vector<8x8xf32>, vector<8x8xf32>, vector<8x8xf32>, vector<8x8xf32>, vector<8x8xf32>, vector<8x8xf32> -> vector<8x64xf32>
    %c1_22 = arith.constant 1 : index
    %c0_23 = arith.constant 0 : index
    %c0_24 = arith.constant 0 : index
    %209 = vector.load %arg3[%c1_22, %c0_23, %c0_24] : memref<4x4x256xf32, #tpu.memory_space<vmem>>, vector<1x4x256xf32>
    %210 = vector.shape_cast %209 : vector<1x4x256xf32> to vector<4x256xf32>
    %211 = vector.extract_strided_slice %210 {offsets = [0, 0], sizes = [1, 64], strides = [1, 1]} : vector<4x256xf32> to vector<1x64xf32>
    %cst_25 = arith.constant 5.000000e-01 : f32
    %212 = vector.broadcast %cst_25 : f32 to vector<1x64xf32>
    %213 = arith.cmpf ogt, %211, %212 : vector<1x64xf32>
    %214 = vector.extract_strided_slice %210 {offsets = [1, 0], sizes = [1, 64], strides = [1, 1]} : vector<4x256xf32> to vector<1x64xf32>
    %cst_26 = arith.constant 5.000000e-01 : f32
    %215 = vector.broadcast %cst_26 : f32 to vector<1x64xf32>
    %216 = arith.cmpf ogt, %214, %215 : vector<1x64xf32>
    %217 = vector.extract_strided_slice %210 {offsets = [2, 0], sizes = [1, 64], strides = [1, 1]} : vector<4x256xf32> to vector<1x64xf32>
    %cst_27 = arith.constant 5.000000e-01 : f32
    %218 = vector.broadcast %cst_27 : f32 to vector<1x64xf32>
    %219 = arith.cmpf ogt, %217, %218 : vector<1x64xf32>
    %220 = vector.extract_strided_slice %210 {offsets = [3, 0], sizes = [1, 64], strides = [1, 1]} : vector<4x256xf32> to vector<1x64xf32>
    %cst_28 = arith.constant 5.000000e-01 : f32
    %221 = vector.broadcast %cst_28 : f32 to vector<1x64xf32>
    %222 = arith.cmpf ogt, %220, %221 : vector<1x64xf32>
    %223 = vector.extract_strided_slice %208 {offsets = [0, 0], sizes = [8, 1], strides = [1, 1]} : vector<8x64xf32> to vector<8x1xf32>
    %224 = vector.extract_strided_slice %208 {offsets = [0, 0], sizes = [8, 63], strides = [1, 1]} : vector<8x64xf32> to vector<8x63xf32>
    %225 = tpu.concatenate %223, %224 in 1 : vector<8x1xf32>, vector<8x63xf32> -> vector<8x64xf32>
    %226 = vector.extract_strided_slice %208 {offsets = [0, 1], sizes = [8, 63], strides = [1, 1]} : vector<8x64xf32> to vector<8x63xf32>
    %227 = vector.extract_strided_slice %208 {offsets = [0, 63], sizes = [8, 1], strides = [1, 1]} : vector<8x64xf32> to vector<8x1xf32>
    %228 = tpu.concatenate %226, %227 in 1 : vector<8x63xf32>, vector<8x1xf32> -> vector<8x64xf32>
    %229 = vector.shape_cast %213 : vector<1x64xi1> to vector<1x64xi1>
    %230 = vector.broadcast %229 : vector<1x64xi1> to vector<8x64xi1>
    %231 = arith.select %230, %228, %225 : vector<8x64xi1>, vector<8x64xf32>
    %232 = vector.shape_cast %216 : vector<1x64xi1> to vector<1x64xi1>
    %233 = vector.broadcast %232 : vector<1x64xi1> to vector<8x64xi1>
    %234 = arith.select %233, %225, %228 : vector<8x64xi1>, vector<8x64xf32>
    %235 = vector.extract_strided_slice %231 {offsets = [0, 0], sizes = [8, 8], strides = [1, 1]} : vector<8x64xf32> to vector<8x8xf32>
    %236 = vector.extract_strided_slice %231 {offsets = [0, 0], sizes = [8, 56], strides = [1, 1]} : vector<8x64xf32> to vector<8x56xf32>
    %237 = tpu.concatenate %235, %236 in 1 : vector<8x8xf32>, vector<8x56xf32> -> vector<8x64xf32>
    %238 = vector.extract_strided_slice %231 {offsets = [0, 8], sizes = [8, 56], strides = [1, 1]} : vector<8x64xf32> to vector<8x56xf32>
    %239 = vector.extract_strided_slice %231 {offsets = [0, 56], sizes = [8, 8], strides = [1, 1]} : vector<8x64xf32> to vector<8x8xf32>
    %240 = tpu.concatenate %238, %239 in 1 : vector<8x56xf32>, vector<8x8xf32> -> vector<8x64xf32>
    %241 = vector.shape_cast %219 : vector<1x64xi1> to vector<1x64xi1>
    %242 = vector.broadcast %241 : vector<1x64xi1> to vector<8x64xi1>
    %243 = arith.select %242, %240, %237 : vector<8x64xi1>, vector<8x64xf32>
    %244 = vector.shape_cast %222 : vector<1x64xi1> to vector<1x64xi1>
    %245 = vector.broadcast %244 : vector<1x64xi1> to vector<8x64xi1>
    %246 = arith.select %245, %237, %240 : vector<8x64xi1>, vector<8x64xf32>
    %247 = vector.extract_strided_slice %208 {offsets = [0, 0], sizes = [8, 8], strides = [1, 1]} : vector<8x64xf32> to vector<8x8xf32>
    %248 = vector.extract_strided_slice %208 {offsets = [0, 0], sizes = [8, 56], strides = [1, 1]} : vector<8x64xf32> to vector<8x56xf32>
    %249 = tpu.concatenate %247, %248 in 1 : vector<8x8xf32>, vector<8x56xf32> -> vector<8x64xf32>
    %250 = vector.extract_strided_slice %208 {offsets = [0, 8], sizes = [8, 56], strides = [1, 1]} : vector<8x64xf32> to vector<8x56xf32>
    %251 = vector.extract_strided_slice %208 {offsets = [0, 56], sizes = [8, 8], strides = [1, 1]} : vector<8x64xf32> to vector<8x8xf32>
    %252 = tpu.concatenate %250, %251 in 1 : vector<8x56xf32>, vector<8x8xf32> -> vector<8x64xf32>
    %253 = vector.shape_cast %219 : vector<1x64xi1> to vector<1x64xi1>
    %254 = vector.broadcast %253 : vector<1x64xi1> to vector<8x64xi1>
    %255 = arith.select %254, %252, %249 : vector<8x64xi1>, vector<8x64xf32>
    %256 = vector.shape_cast %222 : vector<1x64xi1> to vector<1x64xi1>
    %257 = vector.broadcast %256 : vector<1x64xi1> to vector<8x64xi1>
    %258 = arith.select %257, %249, %252 : vector<8x64xi1>, vector<8x64xf32>
    %259 = vector.extract_strided_slice %234 {offsets = [0, 0], sizes = [8, 8], strides = [1, 1]} : vector<8x64xf32> to vector<8x8xf32>
    %260 = vector.extract_strided_slice %234 {offsets = [0, 0], sizes = [8, 56], strides = [1, 1]} : vector<8x64xf32> to vector<8x56xf32>
    %261 = tpu.concatenate %259, %260 in 1 : vector<8x8xf32>, vector<8x56xf32> -> vector<8x64xf32>
    %262 = vector.extract_strided_slice %234 {offsets = [0, 8], sizes = [8, 56], strides = [1, 1]} : vector<8x64xf32> to vector<8x56xf32>
    %263 = vector.extract_strided_slice %234 {offsets = [0, 56], sizes = [8, 8], strides = [1, 1]} : vector<8x64xf32> to vector<8x8xf32>
    %264 = tpu.concatenate %262, %263 in 1 : vector<8x56xf32>, vector<8x8xf32> -> vector<8x64xf32>
    %265 = vector.shape_cast %219 : vector<1x64xi1> to vector<1x64xi1>
    %266 = vector.broadcast %265 : vector<1x64xi1> to vector<8x64xi1>
    %267 = arith.select %266, %264, %261 : vector<8x64xi1>, vector<8x64xf32>
    %268 = vector.shape_cast %222 : vector<1x64xi1> to vector<1x64xi1>
    %269 = vector.broadcast %268 : vector<1x64xi1> to vector<8x64xi1>
    %270 = arith.select %269, %261, %264 : vector<8x64xi1>, vector<8x64xf32>
    %271 = tpu.concatenate %243, %255, %267, %231, %208, %234, %246, %258, %270 in 0 : vector<8x64xf32>, vector<8x64xf32>, vector<8x64xf32>, vector<8x64xf32>, vector<8x64xf32>, vector<8x64xf32>, vector<8x64xf32>, vector<8x64xf32>, vector<8x64xf32> -> vector<72x64xf32>
    %c3 = arith.constant 3 : index
    %c0_29 = arith.constant 0 : index
    %c0_30 = arith.constant 0 : index
    %272 = vector.load %arg2[%c3, %c0_29, %c0_30] : memref<9x8x72xf32, #tpu.memory_space<vmem>>, vector<1x8x72xf32>
    %273 = vector.shape_cast %272 : vector<1x8x72xf32> to vector<8x72xf32>
    %cst_31 = arith.constant dense<0.000000e+00> : vector<8x64xf32>
    %274 = tpu.matmul %273, %271, %cst_31 {dimension_numbers = #tpu.dot_dimension_numbers<[1], [0], [0], [1], [0, 0, 1, 1], [], []>} : vector<8x72xf32>, vector<72x64xf32>, vector<8x64xf32> -> vector<8x64xf32>
    %cst_32 = arith.constant 0.000000e+00 : f32
    %275 = vector.broadcast %cst_32 : f32 to vector<8x64xf32>
    %276 = arith.cmpf oge, %274, %275 : vector<8x64xf32>
    %cst_33 = arith.constant 0.00999999977 : f32
    %277 = vector.broadcast %cst_33 : f32 to vector<8x64xf32>
    %278 = arith.mulf %277, %274 : vector<8x64xf32>
    %279 = arith.select %276, %274, %278 : vector<8x64xi1>, vector<8x64xf32>
    %280 = vector.extract_strided_slice %279 {offsets = [0, 0], sizes = [8, 1], strides = [1, 1]} : vector<8x64xf32> to vector<8x1xf32>
    %281 = vector.extract_strided_slice %279 {offsets = [0, 0], sizes = [8, 63], strides = [1, 1]} : vector<8x64xf32> to vector<8x63xf32>
    %282 = tpu.concatenate %280, %281 in 1 : vector<8x1xf32>, vector<8x63xf32> -> vector<8x64xf32>
    %283 = vector.extract_strided_slice %279 {offsets = [0, 1], sizes = [8, 63], strides = [1, 1]} : vector<8x64xf32> to vector<8x63xf32>
    %284 = vector.extract_strided_slice %279 {offsets = [0, 63], sizes = [8, 1], strides = [1, 1]} : vector<8x64xf32> to vector<8x1xf32>
    %285 = tpu.concatenate %283, %284 in 1 : vector<8x63xf32>, vector<8x1xf32> -> vector<8x64xf32>
    %286 = vector.shape_cast %213 : vector<1x64xi1> to vector<1x64xi1>
    %287 = vector.broadcast %286 : vector<1x64xi1> to vector<8x64xi1>
    %288 = arith.select %287, %285, %282 : vector<8x64xi1>, vector<8x64xf32>
    %289 = vector.shape_cast %216 : vector<1x64xi1> to vector<1x64xi1>
    %290 = vector.broadcast %289 : vector<1x64xi1> to vector<8x64xi1>
    %291 = arith.select %290, %282, %285 : vector<8x64xi1>, vector<8x64xf32>
    %292 = vector.extract_strided_slice %288 {offsets = [0, 0], sizes = [8, 8], strides = [1, 1]} : vector<8x64xf32> to vector<8x8xf32>
    %293 = vector.extract_strided_slice %288 {offsets = [0, 0], sizes = [8, 56], strides = [1, 1]} : vector<8x64xf32> to vector<8x56xf32>
    %294 = tpu.concatenate %292, %293 in 1 : vector<8x8xf32>, vector<8x56xf32> -> vector<8x64xf32>
    %295 = vector.extract_strided_slice %288 {offsets = [0, 8], sizes = [8, 56], strides = [1, 1]} : vector<8x64xf32> to vector<8x56xf32>
    %296 = vector.extract_strided_slice %288 {offsets = [0, 56], sizes = [8, 8], strides = [1, 1]} : vector<8x64xf32> to vector<8x8xf32>
    %297 = tpu.concatenate %295, %296 in 1 : vector<8x56xf32>, vector<8x8xf32> -> vector<8x64xf32>
    %298 = vector.shape_cast %219 : vector<1x64xi1> to vector<1x64xi1>
    %299 = vector.broadcast %298 : vector<1x64xi1> to vector<8x64xi1>
    %300 = arith.select %299, %297, %294 : vector<8x64xi1>, vector<8x64xf32>
    %301 = vector.shape_cast %222 : vector<1x64xi1> to vector<1x64xi1>
    %302 = vector.broadcast %301 : vector<1x64xi1> to vector<8x64xi1>
    %303 = arith.select %302, %294, %297 : vector<8x64xi1>, vector<8x64xf32>
    %304 = vector.extract_strided_slice %279 {offsets = [0, 0], sizes = [8, 8], strides = [1, 1]} : vector<8x64xf32> to vector<8x8xf32>
    %305 = vector.extract_strided_slice %279 {offsets = [0, 0], sizes = [8, 56], strides = [1, 1]} : vector<8x64xf32> to vector<8x56xf32>
    %306 = tpu.concatenate %304, %305 in 1 : vector<8x8xf32>, vector<8x56xf32> -> vector<8x64xf32>
    %307 = vector.extract_strided_slice %279 {offsets = [0, 8], sizes = [8, 56], strides = [1, 1]} : vector<8x64xf32> to vector<8x56xf32>
    %308 = vector.extract_strided_slice %279 {offsets = [0, 56], sizes = [8, 8], strides = [1, 1]} : vector<8x64xf32> to vector<8x8xf32>
    %309 = tpu.concatenate %307, %308 in 1 : vector<8x56xf32>, vector<8x8xf32> -> vector<8x64xf32>
    %310 = vector.shape_cast %219 : vector<1x64xi1> to vector<1x64xi1>
    %311 = vector.broadcast %310 : vector<1x64xi1> to vector<8x64xi1>
    %312 = arith.select %311, %309, %306 : vector<8x64xi1>, vector<8x64xf32>
    %313 = vector.shape_cast %222 : vector<1x64xi1> to vector<1x64xi1>
    %314 = vector.broadcast %313 : vector<1x64xi1> to vector<8x64xi1>
    %315 = arith.select %314, %306, %309 : vector<8x64xi1>, vector<8x64xf32>
    %316 = vector.extract_strided_slice %291 {offsets = [0, 0], sizes = [8, 8], strides = [1, 1]} : vector<8x64xf32> to vector<8x8xf32>
    %317 = vector.extract_strided_slice %291 {offsets = [0, 0], sizes = [8, 56], strides = [1, 1]} : vector<8x64xf32> to vector<8x56xf32>
    %318 = tpu.concatenate %316, %317 in 1 : vector<8x8xf32>, vector<8x56xf32> -> vector<8x64xf32>
    %319 = vector.extract_strided_slice %291 {offsets = [0, 8], sizes = [8, 56], strides = [1, 1]} : vector<8x64xf32> to vector<8x56xf32>
    %320 = vector.extract_strided_slice %291 {offsets = [0, 56], sizes = [8, 8], strides = [1, 1]} : vector<8x64xf32> to vector<8x8xf32>
    %321 = tpu.concatenate %319, %320 in 1 : vector<8x56xf32>, vector<8x8xf32> -> vector<8x64xf32>
    %322 = vector.shape_cast %219 : vector<1x64xi1> to vector<1x64xi1>
    %323 = vector.broadcast %322 : vector<1x64xi1> to vector<8x64xi1>
    %324 = arith.select %323, %321, %318 : vector<8x64xi1>, vector<8x64xf32>
    %325 = vector.shape_cast %222 : vector<1x64xi1> to vector<1x64xi1>
    %326 = vector.broadcast %325 : vector<1x64xi1> to vector<8x64xi1>
    %327 = arith.select %326, %318, %321 : vector<8x64xi1>, vector<8x64xf32>
    %328 = tpu.concatenate %300, %312, %324, %288, %279, %291, %303, %315, %327 in 0 : vector<8x64xf32>, vector<8x64xf32>, vector<8x64xf32>, vector<8x64xf32>, vector<8x64xf32>, vector<8x64xf32>, vector<8x64xf32>, vector<8x64xf32>, vector<8x64xf32> -> vector<72x64xf32>
    %c4 = arith.constant 4 : index
    %c0_34 = arith.constant 0 : index
    %c0_35 = arith.constant 0 : index
    %329 = vector.load %arg2[%c4, %c0_34, %c0_35] : memref<9x8x72xf32, #tpu.memory_space<vmem>>, vector<1x8x72xf32>
    %330 = vector.shape_cast %329 : vector<1x8x72xf32> to vector<8x72xf32>
    %cst_36 = arith.constant dense<0.000000e+00> : vector<8x64xf32>
    %331 = tpu.matmul %330, %328, %cst_36 {dimension_numbers = #tpu.dot_dimension_numbers<[1], [0], [0], [1], [0, 0, 1, 1], [], []>} : vector<8x72xf32>, vector<72x64xf32>, vector<8x64xf32> -> vector<8x64xf32>
    %cst_37 = arith.constant 0.000000e+00 : f32
    %332 = vector.broadcast %cst_37 : f32 to vector<8x64xf32>
    %333 = arith.cmpf oge, %331, %332 : vector<8x64xf32>
    %cst_38 = arith.constant 0.00999999977 : f32
    %334 = vector.broadcast %cst_38 : f32 to vector<8x64xf32>
    %335 = arith.mulf %334, %331 : vector<8x64xf32>
    %336 = arith.select %333, %331, %335 : vector<8x64xi1>, vector<8x64xf32>
    %c0_39 = arith.constant 0 : index
    %c0_40 = arith.constant 0 : index
    %c0_41 = arith.constant 0 : index
    %337 = vector.load %arg5[%c0_39, %c0_40, %c0_41] : memref<1x8x64xf32, #tpu.memory_space<vmem>>, vector<1x8x64xf32>
    %338 = vector.shape_cast %337 : vector<1x8x64xf32> to vector<8x64xf32>
    %339 = vector.shape_cast %336 : vector<8x64xf32> to vector<1x8x64xf32>
    tpu.vector_store %arg5[%c0_39, %c0_40, %c0_41], %339 {strides = array<i32>} : memref<1x8x64xf32, #tpu.memory_space<vmem>>, vector<1x8x64xf32>,
    %340 = vector.extract_strided_slice %336 {offsets = [0, 8], sizes = [8, 56], strides = [1, 1]} : vector<8x64xf32> to vector<8x56xf32>
    %341 = vector.extract_strided_slice %336 {offsets = [0, 56], sizes = [8, 8], strides = [1, 1]} : vector<8x64xf32> to vector<8x8xf32>
    %342 = tpu.concatenate %340, %341 in 1 : vector<8x56xf32>, vector<8x8xf32> -> vector<8x64xf32>
    %343 = arith.maximumf %336, %342 : vector<8x64xf32>
    %344 = vector.extract_strided_slice %343 {offsets = [0, 0], sizes = [8, 8], strides = [1, 1]} : vector<8x64xf32> to vector<8x8xf32>
    %345 = vector.extract_strided_slice %343 {offsets = [0, 16], sizes = [8, 8], strides = [1, 1]} : vector<8x64xf32> to vector<8x8xf32>
    %346 = vector.extract_strided_slice %343 {offsets = [0, 32], sizes = [8, 8], strides = [1, 1]} : vector<8x64xf32> to vector<8x8xf32>
    %347 = vector.extract_strided_slice %343 {offsets = [0, 48], sizes = [8, 8], strides = [1, 1]} : vector<8x64xf32> to vector<8x8xf32>
    %348 = tpu.concatenate %344, %345, %346, %347 in 0 : vector<8x8xf32>, vector<8x8xf32>, vector<8x8xf32>, vector<8x8xf32> -> vector<32x8xf32>
    %349 = vector.extract_strided_slice %348 {offsets = [0, 1], sizes = [32, 7], strides = [1, 1]} : vector<32x8xf32> to vector<32x7xf32>
    %350 = vector.extract_strided_slice %348 {offsets = [0, 7], sizes = [32, 1], strides = [1, 1]} : vector<32x8xf32> to vector<32x1xf32>
    %351 = tpu.concatenate %349, %350 in 1 : vector<32x7xf32>, vector<32x1xf32> -> vector<32x8xf32>
    %352 = arith.maximumf %348, %351 : vector<32x8xf32>
    %353 = tpu.iota {dimensions = array<i32: 0>} : vector<8x4xi32>
    %354 = tpu.iota {dimensions = array<i32: 1>} : vector<8x4xi32>
    %c2_i32_42 = arith.constant 2 : i32
    %355 = vector.broadcast %c2_i32_42 : i32 to vector<8x4xi32>
    %356 = arith.muli %355, %354 : vector<8x4xi32>
    %357 = arith.cmpi eq, %353, %356 : vector<8x4xi32>
    %358 = arith.extui %357 : vector<8x4xi1> to vector<8x4xi32>
    %359 = arith.sitofp %358 : vector<8x4xi32> to vector<8x4xf32>
    %cst_43 = arith.constant dense<0.000000e+00> : vector<32x4xf32>
    %360 = tpu.matmul %352, %359, %cst_43 {dimension_numbers = #tpu.dot_dimension_numbers<[1], [0], [0], [1], [0, 0, 1, 1], [], []>} : vector<32x8xf32>, vector<8x4xf32>, vector<32x4xf32> -> vector<32x4xf32>
    %361 = vector.extract_strided_slice %360 {offsets = [0, 0], sizes = [8, 4], strides = [1, 1]} : vector<32x4xf32> to vector<8x4xf32>
    %362 = vector.extract_strided_slice %360 {offsets = [8, 0], sizes = [8, 4], strides = [1, 1]} : vector<32x4xf32> to vector<8x4xf32>
    %363 = vector.extract_strided_slice %360 {offsets = [16, 0], sizes = [8, 4], strides = [1, 1]} : vector<32x4xf32> to vector<8x4xf32>
    %364 = vector.extract_strided_slice %360 {offsets = [24, 0], sizes = [8, 4], strides = [1, 1]} : vector<32x4xf32> to vector<8x4xf32>
    %365 = tpu.concatenate %361, %362, %363, %364 in 1 : vector<8x4xf32>, vector<8x4xf32>, vector<8x4xf32>, vector<8x4xf32> -> vector<8x16xf32>
    %c2_44 = arith.constant 2 : index
    %c0_45 = arith.constant 0 : index
    %c0_46 = arith.constant 0 : index
    %366 = vector.load %arg3[%c2_44, %c0_45, %c0_46] : memref<4x4x256xf32, #tpu.memory_space<vmem>>, vector<1x4x256xf32>
    %367 = vector.shape_cast %366 : vector<1x4x256xf32> to vector<4x256xf32>
    %368 = vector.extract_strided_slice %367 {offsets = [0, 0], sizes = [1, 16], strides = [1, 1]} : vector<4x256xf32> to vector<1x16xf32>
    %cst_47 = arith.constant 5.000000e-01 : f32
    %369 = vector.broadcast %cst_47 : f32 to vector<1x16xf32>
    %370 = arith.cmpf ogt, %368, %369 : vector<1x16xf32>
    %371 = vector.extract_strided_slice %367 {offsets = [1, 0], sizes = [1, 16], strides = [1, 1]} : vector<4x256xf32> to vector<1x16xf32>
    %cst_48 = arith.constant 5.000000e-01 : f32
    %372 = vector.broadcast %cst_48 : f32 to vector<1x16xf32>
    %373 = arith.cmpf ogt, %371, %372 : vector<1x16xf32>
    %374 = vector.extract_strided_slice %367 {offsets = [2, 0], sizes = [1, 16], strides = [1, 1]} : vector<4x256xf32> to vector<1x16xf32>
    %cst_49 = arith.constant 5.000000e-01 : f32
    %375 = vector.broadcast %cst_49 : f32 to vector<1x16xf32>
    %376 = arith.cmpf ogt, %374, %375 : vector<1x16xf32>
    %377 = vector.extract_strided_slice %367 {offsets = [3, 0], sizes = [1, 16], strides = [1, 1]} : vector<4x256xf32> to vector<1x16xf32>
    %cst_50 = arith.constant 5.000000e-01 : f32
    %378 = vector.broadcast %cst_50 : f32 to vector<1x16xf32>
    %379 = arith.cmpf ogt, %377, %378 : vector<1x16xf32>
    %380 = vector.extract_strided_slice %365 {offsets = [0, 0], sizes = [8, 1], strides = [1, 1]} : vector<8x16xf32> to vector<8x1xf32>
    %381 = vector.extract_strided_slice %365 {offsets = [0, 0], sizes = [8, 15], strides = [1, 1]} : vector<8x16xf32> to vector<8x15xf32>
    %382 = tpu.concatenate %380, %381 in 1 : vector<8x1xf32>, vector<8x15xf32> -> vector<8x16xf32>
    %383 = vector.extract_strided_slice %365 {offsets = [0, 1], sizes = [8, 15], strides = [1, 1]} : vector<8x16xf32> to vector<8x15xf32>
    %384 = vector.extract_strided_slice %365 {offsets = [0, 15], sizes = [8, 1], strides = [1, 1]} : vector<8x16xf32> to vector<8x1xf32>
    %385 = tpu.concatenate %383, %384 in 1 : vector<8x15xf32>, vector<8x1xf32> -> vector<8x16xf32>
    %386 = vector.shape_cast %370 : vector<1x16xi1> to vector<1x16xi1>
    %387 = vector.broadcast %386 : vector<1x16xi1> to vector<8x16xi1>
    %388 = arith.select %387, %385, %382 : vector<8x16xi1>, vector<8x16xf32>
    %389 = vector.shape_cast %373 : vector<1x16xi1> to vector<1x16xi1>
    %390 = vector.broadcast %389 : vector<1x16xi1> to vector<8x16xi1>
    %391 = arith.select %390, %382, %385 : vector<8x16xi1>, vector<8x16xf32>
    %392 = vector.extract_strided_slice %388 {offsets = [0, 0], sizes = [8, 4], strides = [1, 1]} : vector<8x16xf32> to vector<8x4xf32>
    %393 = vector.extract_strided_slice %388 {offsets = [0, 0], sizes = [8, 12], strides = [1, 1]} : vector<8x16xf32> to vector<8x12xf32>
    %394 = tpu.concatenate %392, %393 in 1 : vector<8x4xf32>, vector<8x12xf32> -> vector<8x16xf32>
    %395 = vector.extract_strided_slice %388 {offsets = [0, 4], sizes = [8, 12], strides = [1, 1]} : vector<8x16xf32> to vector<8x12xf32>
    %396 = vector.extract_strided_slice %388 {offsets = [0, 12], sizes = [8, 4], strides = [1, 1]} : vector<8x16xf32> to vector<8x4xf32>
    %397 = tpu.concatenate %395, %396 in 1 : vector<8x12xf32>, vector<8x4xf32> -> vector<8x16xf32>
    %398 = vector.shape_cast %376 : vector<1x16xi1> to vector<1x16xi1>
    %399 = vector.broadcast %398 : vector<1x16xi1> to vector<8x16xi1>
    %400 = arith.select %399, %397, %394 : vector<8x16xi1>, vector<8x16xf32>
    %401 = vector.shape_cast %379 : vector<1x16xi1> to vector<1x16xi1>
    %402 = vector.broadcast %401 : vector<1x16xi1> to vector<8x16xi1>
    %403 = arith.select %402, %394, %397 : vector<8x16xi1>, vector<8x16xf32>
    %404 = vector.extract_strided_slice %365 {offsets = [0, 0], sizes = [8, 4], strides = [1, 1]} : vector<8x16xf32> to vector<8x4xf32>
    %405 = vector.extract_strided_slice %365 {offsets = [0, 0], sizes = [8, 12], strides = [1, 1]} : vector<8x16xf32> to vector<8x12xf32>
    %406 = tpu.concatenate %404, %405 in 1 : vector<8x4xf32>, vector<8x12xf32> -> vector<8x16xf32>
    %407 = vector.extract_strided_slice %365 {offsets = [0, 4], sizes = [8, 12], strides = [1, 1]} : vector<8x16xf32> to vector<8x12xf32>
    %408 = vector.extract_strided_slice %365 {offsets = [0, 12], sizes = [8, 4], strides = [1, 1]} : vector<8x16xf32> to vector<8x4xf32>
    %409 = tpu.concatenate %407, %408 in 1 : vector<8x12xf32>, vector<8x4xf32> -> vector<8x16xf32>
    %410 = vector.shape_cast %376 : vector<1x16xi1> to vector<1x16xi1>
    %411 = vector.broadcast %410 : vector<1x16xi1> to vector<8x16xi1>
    %412 = arith.select %411, %409, %406 : vector<8x16xi1>, vector<8x16xf32>
    %413 = vector.shape_cast %379 : vector<1x16xi1> to vector<1x16xi1>
    %414 = vector.broadcast %413 : vector<1x16xi1> to vector<8x16xi1>
    %415 = arith.select %414, %406, %409 : vector<8x16xi1>, vector<8x16xf32>
    %416 = vector.extract_strided_slice %391 {offsets = [0, 0], sizes = [8, 4], strides = [1, 1]} : vector<8x16xf32> to vector<8x4xf32>
    %417 = vector.extract_strided_slice %391 {offsets = [0, 0], sizes = [8, 12], strides = [1, 1]} : vector<8x16xf32> to vector<8x12xf32>
    %418 = tpu.concatenate %416, %417 in 1 : vector<8x4xf32>, vector<8x12xf32> -> vector<8x16xf32>
    %419 = vector.extract_strided_slice %391 {offsets = [0, 4], sizes = [8, 12], strides = [1, 1]} : vector<8x16xf32> to vector<8x12xf32>
    %420 = vector.extract_strided_slice %391 {offsets = [0, 12], sizes = [8, 4], strides = [1, 1]} : vector<8x16xf32> to vector<8x4xf32>
    %421 = tpu.concatenate %419, %420 in 1 : vector<8x12xf32>, vector<8x4xf32> -> vector<8x16xf32>
    %422 = vector.shape_cast %376 : vector<1x16xi1> to vector<1x16xi1>
    %423 = vector.broadcast %422 : vector<1x16xi1> to vector<8x16xi1>
    %424 = arith.select %423, %421, %418 : vector<8x16xi1>, vector<8x16xf32>
    %425 = vector.shape_cast %379 : vector<1x16xi1> to vector<1x16xi1>
    %426 = vector.broadcast %425 : vector<1x16xi1> to vector<8x16xi1>
    %427 = arith.select %426, %418, %421 : vector<8x16xi1>, vector<8x16xf32>
    %428 = tpu.concatenate %400, %412, %424, %388, %365, %391, %403, %415, %427 in 0 : vector<8x16xf32>, vector<8x16xf32>, vector<8x16xf32>, vector<8x16xf32>, vector<8x16xf32>, vector<8x16xf32>, vector<8x16xf32>, vector<8x16xf32>, vector<8x16xf32> -> vector<72x16xf32>
    %c5 = arith.constant 5 : index
    %c0_51 = arith.constant 0 : index
    %c0_52 = arith.constant 0 : index
    %429 = vector.load %arg2[%c5, %c0_51, %c0_52] : memref<9x8x72xf32, #tpu.memory_space<vmem>>, vector<1x8x72xf32>
    %430 = vector.shape_cast %429 : vector<1x8x72xf32> to vector<8x72xf32>
    %cst_53 = arith.constant dense<0.000000e+00> : vector<8x16xf32>
    %431 = tpu.matmul %430, %428, %cst_53 {dimension_numbers = #tpu.dot_dimension_numbers<[1], [0], [0], [1], [0, 0, 1, 1], [], []>} : vector<8x72xf32>, vector<72x16xf32>, vector<8x16xf32> -> vector<8x16xf32>
    %cst_54 = arith.constant 0.000000e+00 : f32
    %432 = vector.broadcast %cst_54 : f32 to vector<8x16xf32>
    %433 = arith.cmpf oge, %431, %432 : vector<8x16xf32>
    %cst_55 = arith.constant 0.00999999977 : f32
    %434 = vector.broadcast %cst_55 : f32 to vector<8x16xf32>
    %435 = arith.mulf %434, %431 : vector<8x16xf32>
    %436 = arith.select %433, %431, %435 : vector<8x16xi1>, vector<8x16xf32>
    %437 = vector.extract_strided_slice %436 {offsets = [0, 0], sizes = [8, 1], strides = [1, 1]} : vector<8x16xf32> to vector<8x1xf32>
    %438 = vector.extract_strided_slice %436 {offsets = [0, 0], sizes = [8, 15], strides = [1, 1]} : vector<8x16xf32> to vector<8x15xf32>
    %439 = tpu.concatenate %437, %438 in 1 : vector<8x1xf32>, vector<8x15xf32> -> vector<8x16xf32>
    %440 = vector.extract_strided_slice %436 {offsets = [0, 1], sizes = [8, 15], strides = [1, 1]} : vector<8x16xf32> to vector<8x15xf32>
    %441 = vector.extract_strided_slice %436 {offsets = [0, 15], sizes = [8, 1], strides = [1, 1]} : vector<8x16xf32> to vector<8x1xf32>
    %442 = tpu.concatenate %440, %441 in 1 : vector<8x15xf32>, vector<8x1xf32> -> vector<8x16xf32>
    %443 = vector.shape_cast %370 : vector<1x16xi1> to vector<1x16xi1>
    %444 = vector.broadcast %443 : vector<1x16xi1> to vector<8x16xi1>
    %445 = arith.select %444, %442, %439 : vector<8x16xi1>, vector<8x16xf32>
    %446 = vector.shape_cast %373 : vector<1x16xi1> to vector<1x16xi1>
    %447 = vector.broadcast %446 : vector<1x16xi1> to vector<8x16xi1>
    %448 = arith.select %447, %439, %442 : vector<8x16xi1>, vector<8x16xf32>
    %449 = vector.extract_strided_slice %445 {offsets = [0, 0], sizes = [8, 4], strides = [1, 1]} : vector<8x16xf32> to vector<8x4xf32>
    %450 = vector.extract_strided_slice %445 {offsets = [0, 0], sizes = [8, 12], strides = [1, 1]} : vector<8x16xf32> to vector<8x12xf32>
    %451 = tpu.concatenate %449, %450 in 1 : vector<8x4xf32>, vector<8x12xf32> -> vector<8x16xf32>
    %452 = vector.extract_strided_slice %445 {offsets = [0, 4], sizes = [8, 12], strides = [1, 1]} : vector<8x16xf32> to vector<8x12xf32>
    %453 = vector.extract_strided_slice %445 {offsets = [0, 12], sizes = [8, 4], strides = [1, 1]} : vector<8x16xf32> to vector<8x4xf32>
    %454 = tpu.concatenate %452, %453 in 1 : vector<8x12xf32>, vector<8x4xf32> -> vector<8x16xf32>
    %455 = vector.shape_cast %376 : vector<1x16xi1> to vector<1x16xi1>
    %456 = vector.broadcast %455 : vector<1x16xi1> to vector<8x16xi1>
    %457 = arith.select %456, %454, %451 : vector<8x16xi1>, vector<8x16xf32>
    %458 = vector.shape_cast %379 : vector<1x16xi1> to vector<1x16xi1>
    %459 = vector.broadcast %458 : vector<1x16xi1> to vector<8x16xi1>
    %460 = arith.select %459, %451, %454 : vector<8x16xi1>, vector<8x16xf32>
    %461 = vector.extract_strided_slice %436 {offsets = [0, 0], sizes = [8, 4], strides = [1, 1]} : vector<8x16xf32> to vector<8x4xf32>
    %462 = vector.extract_strided_slice %436 {offsets = [0, 0], sizes = [8, 12], strides = [1, 1]} : vector<8x16xf32> to vector<8x12xf32>
    %463 = tpu.concatenate %461, %462 in 1 : vector<8x4xf32>, vector<8x12xf32> -> vector<8x16xf32>
    %464 = vector.extract_strided_slice %436 {offsets = [0, 4], sizes = [8, 12], strides = [1, 1]} : vector<8x16xf32> to vector<8x12xf32>
    %465 = vector.extract_strided_slice %436 {offsets = [0, 12], sizes = [8, 4], strides = [1, 1]} : vector<8x16xf32> to vector<8x4xf32>
    %466 = tpu.concatenate %464, %465 in 1 : vector<8x12xf32>, vector<8x4xf32> -> vector<8x16xf32>
    %467 = vector.shape_cast %376 : vector<1x16xi1> to vector<1x16xi1>
    %468 = vector.broadcast %467 : vector<1x16xi1> to vector<8x16xi1>
    %469 = arith.select %468, %466, %463 : vector<8x16xi1>, vector<8x16xf32>
    %470 = vector.shape_cast %379 : vector<1x16xi1> to vector<1x16xi1>
    %471 = vector.broadcast %470 : vector<1x16xi1> to vector<8x16xi1>
    %472 = arith.select %471, %463, %466 : vector<8x16xi1>, vector<8x16xf32>
    %473 = vector.extract_strided_slice %448 {offsets = [0, 0], sizes = [8, 4], strides = [1, 1]} : vector<8x16xf32> to vector<8x4xf32>
    %474 = vector.extract_strided_slice %448 {offsets = [0, 0], sizes = [8, 12], strides = [1, 1]} : vector<8x16xf32> to vector<8x12xf32>
    %475 = tpu.concatenate %473, %474 in 1 : vector<8x4xf32>, vector<8x12xf32> -> vector<8x16xf32>
    %476 = vector.extract_strided_slice %448 {offsets = [0, 4], sizes = [8, 12], strides = [1, 1]} : vector<8x16xf32> to vector<8x12xf32>
    %477 = vector.extract_strided_slice %448 {offsets = [0, 12], sizes = [8, 4], strides = [1, 1]} : vector<8x16xf32> to vector<8x4xf32>
    %478 = tpu.concatenate %476, %477 in 1 : vector<8x12xf32>, vector<8x4xf32> -> vector<8x16xf32>
    %479 = vector.shape_cast %376 : vector<1x16xi1> to vector<1x16xi1>
    %480 = vector.broadcast %479 : vector<1x16xi1> to vector<8x16xi1>
    %481 = arith.select %480, %478, %475 : vector<8x16xi1>, vector<8x16xf32>
    %482 = vector.shape_cast %379 : vector<1x16xi1> to vector<1x16xi1>
    %483 = vector.broadcast %482 : vector<1x16xi1> to vector<8x16xi1>
    %484 = arith.select %483, %475, %478 : vector<8x16xi1>, vector<8x16xf32>
    %485 = tpu.concatenate %457, %469, %481, %445, %436, %448, %460, %472, %484 in 0 : vector<8x16xf32>, vector<8x16xf32>, vector<8x16xf32>, vector<8x16xf32>, vector<8x16xf32>, vector<8x16xf32>, vector<8x16xf32>, vector<8x16xf32>, vector<8x16xf32> -> vector<72x16xf32>
    %c6 = arith.constant 6 : index
    %c0_56 = arith.constant 0 : index
    %c0_57 = arith.constant 0 : index
    %486 = vector.load %arg2[%c6, %c0_56, %c0_57] : memref<9x8x72xf32, #tpu.memory_space<vmem>>, vector<1x8x72xf32>
    %487 = vector.shape_cast %486 : vector<1x8x72xf32> to vector<8x72xf32>
    %cst_58 = arith.constant dense<0.000000e+00> : vector<8x16xf32>
    %488 = tpu.matmul %487, %485, %cst_58 {dimension_numbers = #tpu.dot_dimension_numbers<[1], [0], [0], [1], [0, 0, 1, 1], [], []>} : vector<8x72xf32>, vector<72x16xf32>, vector<8x16xf32> -> vector<8x16xf32>
    %cst_59 = arith.constant 0.000000e+00 : f32
    %489 = vector.broadcast %cst_59 : f32 to vector<8x16xf32>
    %490 = arith.cmpf oge, %488, %489 : vector<8x16xf32>
    %cst_60 = arith.constant 0.00999999977 : f32
    %491 = vector.broadcast %cst_60 : f32 to vector<8x16xf32>
    %492 = arith.mulf %491, %488 : vector<8x16xf32>
    %493 = arith.select %490, %488, %492 : vector<8x16xi1>, vector<8x16xf32>
    %c0_61 = arith.constant 0 : index
    %c0_62 = arith.constant 0 : index
    %c0_63 = arith.constant 0 : index
    %494 = vector.load %arg6[%c0_61, %c0_62, %c0_63] : memref<1x8x16xf32, #tpu.memory_space<vmem>>, vector<1x8x16xf32>
    %495 = vector.shape_cast %494 : vector<1x8x16xf32> to vector<8x16xf32>
    %496 = vector.shape_cast %493 : vector<8x16xf32> to vector<1x8x16xf32>
    tpu.vector_store %arg6[%c0_61, %c0_62, %c0_63], %496 {strides = array<i32>} : memref<1x8x16xf32, #tpu.memory_space<vmem>>, vector<1x8x16xf32>,
    %497 = vector.extract_strided_slice %493 {offsets = [0, 4], sizes = [8, 12], strides = [1, 1]} : vector<8x16xf32> to vector<8x12xf32>
    %498 = vector.extract_strided_slice %493 {offsets = [0, 12], sizes = [8, 4], strides = [1, 1]} : vector<8x16xf32> to vector<8x4xf32>
    %499 = tpu.concatenate %497, %498 in 1 : vector<8x12xf32>, vector<8x4xf32> -> vector<8x16xf32>
    %500 = arith.maximumf %493, %499 : vector<8x16xf32>
    %501 = vector.extract_strided_slice %500 {offsets = [0, 0], sizes = [8, 4], strides = [1, 1]} : vector<8x16xf32> to vector<8x4xf32>
    %502 = vector.extract_strided_slice %500 {offsets = [0, 8], sizes = [8, 4], strides = [1, 1]} : vector<8x16xf32> to vector<8x4xf32>
    %503 = tpu.concatenate %501, %502 in 0 : vector<8x4xf32>, vector<8x4xf32> -> vector<16x4xf32>
    %504 = vector.extract_strided_slice %503 {offsets = [0, 1], sizes = [16, 3], strides = [1, 1]} : vector<16x4xf32> to vector<16x3xf32>
    %505 = vector.extract_strided_slice %503 {offsets = [0, 3], sizes = [16, 1], strides = [1, 1]} : vector<16x4xf32> to vector<16x1xf32>
    %506 = tpu.concatenate %504, %505 in 1 : vector<16x3xf32>, vector<16x1xf32> -> vector<16x4xf32>
    %507 = arith.maximumf %503, %506 : vector<16x4xf32>
    %508 = tpu.iota {dimensions = array<i32: 0>} : vector<4x2xi32>
    %509 = tpu.iota {dimensions = array<i32: 1>} : vector<4x2xi32>
    %c2_i32_64 = arith.constant 2 : i32
    %510 = vector.broadcast %c2_i32_64 : i32 to vector<4x2xi32>
    %511 = arith.muli %510, %509 : vector<4x2xi32>
    %512 = arith.cmpi eq, %508, %511 : vector<4x2xi32>
    %513 = arith.extui %512 : vector<4x2xi1> to vector<4x2xi32>
    %514 = arith.sitofp %513 : vector<4x2xi32> to vector<4x2xf32>
    %cst_65 = arith.constant dense<0.000000e+00> : vector<16x2xf32>
    %515 = tpu.matmul %507, %514, %cst_65 {dimension_numbers = #tpu.dot_dimension_numbers<[1], [0], [0], [1], [0, 0, 1, 1], [], []>} : vector<16x4xf32>, vector<4x2xf32>, vector<16x2xf32> -> vector<16x2xf32>
    %516 = vector.extract_strided_slice %515 {offsets = [0, 0], sizes = [8, 2], strides = [1, 1]} : vector<16x2xf32> to vector<8x2xf32>
    %517 = vector.extract_strided_slice %515 {offsets = [8, 0], sizes = [8, 2], strides = [1, 1]} : vector<16x2xf32> to vector<8x2xf32>
    %518 = tpu.concatenate %516, %517 in 1 : vector<8x2xf32>, vector<8x2xf32> -> vector<8x4xf32>
    %c3_66 = arith.constant 3 : index
    %c0_67 = arith.constant 0 : index
    %c0_68 = arith.constant 0 : index
    %519 = vector.load %arg3[%c3_66, %c0_67, %c0_68] : memref<4x4x256xf32, #tpu.memory_space<vmem>>, vector<1x4x256xf32>
    %520 = vector.shape_cast %519 : vector<1x4x256xf32> to vector<4x256xf32>
    %521 = vector.extract_strided_slice %520 {offsets = [0, 0], sizes = [1, 4], strides = [1, 1]} : vector<4x256xf32> to vector<1x4xf32>
    %cst_69 = arith.constant 5.000000e-01 : f32
    %522 = vector.broadcast %cst_69 : f32 to vector<1x4xf32>
    %523 = arith.cmpf ogt, %521, %522 : vector<1x4xf32>
    %524 = vector.extract_strided_slice %520 {offsets = [1, 0], sizes = [1, 4], strides = [1, 1]} : vector<4x256xf32> to vector<1x4xf32>
    %cst_70 = arith.constant 5.000000e-01 : f32
    %525 = vector.broadcast %cst_70 : f32 to vector<1x4xf32>
    %526 = arith.cmpf ogt, %524, %525 : vector<1x4xf32>
    %527 = vector.extract_strided_slice %520 {offsets = [2, 0], sizes = [1, 4], strides = [1, 1]} : vector<4x256xf32> to vector<1x4xf32>
    %cst_71 = arith.constant 5.000000e-01 : f32
    %528 = vector.broadcast %cst_71 : f32 to vector<1x4xf32>
    %529 = arith.cmpf ogt, %527, %528 : vector<1x4xf32>
    %530 = vector.extract_strided_slice %520 {offsets = [3, 0], sizes = [1, 4], strides = [1, 1]} : vector<4x256xf32> to vector<1x4xf32>
    %cst_72 = arith.constant 5.000000e-01 : f32
    %531 = vector.broadcast %cst_72 : f32 to vector<1x4xf32>
    %532 = arith.cmpf ogt, %530, %531 : vector<1x4xf32>
    %533 = vector.extract_strided_slice %518 {offsets = [0, 0], sizes = [8, 1], strides = [1, 1]} : vector<8x4xf32> to vector<8x1xf32>
    %534 = vector.extract_strided_slice %518 {offsets = [0, 0], sizes = [8, 3], strides = [1, 1]} : vector<8x4xf32> to vector<8x3xf32>
    %535 = tpu.concatenate %533, %534 in 1 : vector<8x1xf32>, vector<8x3xf32> -> vector<8x4xf32>
    %536 = vector.extract_strided_slice %518 {offsets = [0, 1], sizes = [8, 3], strides = [1, 1]} : vector<8x4xf32> to vector<8x3xf32>
    %537 = vector.extract_strided_slice %518 {offsets = [0, 3], sizes = [8, 1], strides = [1, 1]} : vector<8x4xf32> to vector<8x1xf32>
    %538 = tpu.concatenate %536, %537 in 1 : vector<8x3xf32>, vector<8x1xf32> -> vector<8x4xf32>
    %539 = vector.shape_cast %523 : vector<1x4xi1> to vector<1x4xi1>
    %540 = vector.broadcast %539 : vector<1x4xi1> to vector<8x4xi1>
    %541 = arith.select %540, %538, %535 : vector<8x4xi1>, vector<8x4xf32>
    %542 = vector.shape_cast %526 : vector<1x4xi1> to vector<1x4xi1>
    %543 = vector.broadcast %542 : vector<1x4xi1> to vector<8x4xi1>
    %544 = arith.select %543, %535, %538 : vector<8x4xi1>, vector<8x4xf32>
    %545 = vector.extract_strided_slice %541 {offsets = [0, 0], sizes = [8, 2], strides = [1, 1]} : vector<8x4xf32> to vector<8x2xf32>
    %546 = vector.extract_strided_slice %541 {offsets = [0, 0], sizes = [8, 2], strides = [1, 1]} : vector<8x4xf32> to vector<8x2xf32>
    %547 = tpu.concatenate %545, %546 in 1 : vector<8x2xf32>, vector<8x2xf32> -> vector<8x4xf32>
    %548 = vector.extract_strided_slice %541 {offsets = [0, 2], sizes = [8, 2], strides = [1, 1]} : vector<8x4xf32> to vector<8x2xf32>
    %549 = vector.extract_strided_slice %541 {offsets = [0, 2], sizes = [8, 2], strides = [1, 1]} : vector<8x4xf32> to vector<8x2xf32>
    %550 = tpu.concatenate %548, %549 in 1 : vector<8x2xf32>, vector<8x2xf32> -> vector<8x4xf32>
    %551 = vector.shape_cast %529 : vector<1x4xi1> to vector<1x4xi1>
    %552 = vector.broadcast %551 : vector<1x4xi1> to vector<8x4xi1>
    %553 = arith.select %552, %550, %547 : vector<8x4xi1>, vector<8x4xf32>
    %554 = vector.shape_cast %532 : vector<1x4xi1> to vector<1x4xi1>
    %555 = vector.broadcast %554 : vector<1x4xi1> to vector<8x4xi1>
    %556 = arith.select %555, %547, %550 : vector<8x4xi1>, vector<8x4xf32>
    %557 = vector.extract_strided_slice %518 {offsets = [0, 0], sizes = [8, 2], strides = [1, 1]} : vector<8x4xf32> to vector<8x2xf32>
    %558 = vector.extract_strided_slice %518 {offsets = [0, 0], sizes = [8, 2], strides = [1, 1]} : vector<8x4xf32> to vector<8x2xf32>
    %559 = tpu.concatenate %557, %558 in 1 : vector<8x2xf32>, vector<8x2xf32> -> vector<8x4xf32>
    %560 = vector.extract_strided_slice %518 {offsets = [0, 2], sizes = [8, 2], strides = [1, 1]} : vector<8x4xf32> to vector<8x2xf32>
    %561 = vector.extract_strided_slice %518 {offsets = [0, 2], sizes = [8, 2], strides = [1, 1]} : vector<8x4xf32> to vector<8x2xf32>
    %562 = tpu.concatenate %560, %561 in 1 : vector<8x2xf32>, vector<8x2xf32> -> vector<8x4xf32>
    %563 = vector.shape_cast %529 : vector<1x4xi1> to vector<1x4xi1>
    %564 = vector.broadcast %563 : vector<1x4xi1> to vector<8x4xi1>
    %565 = arith.select %564, %562, %559 : vector<8x4xi1>, vector<8x4xf32>
    %566 = vector.shape_cast %532 : vector<1x4xi1> to vector<1x4xi1>
    %567 = vector.broadcast %566 : vector<1x4xi1> to vector<8x4xi1>
    %568 = arith.select %567, %559, %562 : vector<8x4xi1>, vector<8x4xf32>
    %569 = vector.extract_strided_slice %544 {offsets = [0, 0], sizes = [8, 2], strides = [1, 1]} : vector<8x4xf32> to vector<8x2xf32>
    %570 = vector.extract_strided_slice %544 {offsets = [0, 0], sizes = [8, 2], strides = [1, 1]} : vector<8x4xf32> to vector<8x2xf32>
    %571 = tpu.concatenate %569, %570 in 1 : vector<8x2xf32>, vector<8x2xf32> -> vector<8x4xf32>
    %572 = vector.extract_strided_slice %544 {offsets = [0, 2], sizes = [8, 2], strides = [1, 1]} : vector<8x4xf32> to vector<8x2xf32>
    %573 = vector.extract_strided_slice %544 {offsets = [0, 2], sizes = [8, 2], strides = [1, 1]} : vector<8x4xf32> to vector<8x2xf32>
    %574 = tpu.concatenate %572, %573 in 1 : vector<8x2xf32>, vector<8x2xf32> -> vector<8x4xf32>
    %575 = vector.shape_cast %529 : vector<1x4xi1> to vector<1x4xi1>
    %576 = vector.broadcast %575 : vector<1x4xi1> to vector<8x4xi1>
    %577 = arith.select %576, %574, %571 : vector<8x4xi1>, vector<8x4xf32>
    %578 = vector.shape_cast %532 : vector<1x4xi1> to vector<1x4xi1>
    %579 = vector.broadcast %578 : vector<1x4xi1> to vector<8x4xi1>
    %580 = arith.select %579, %571, %574 : vector<8x4xi1>, vector<8x4xf32>
    %581 = tpu.concatenate %553, %565, %577, %541, %518, %544, %556, %568, %580 in 0 : vector<8x4xf32>, vector<8x4xf32>, vector<8x4xf32>, vector<8x4xf32>, vector<8x4xf32>, vector<8x4xf32>, vector<8x4xf32>, vector<8x4xf32>, vector<8x4xf32> -> vector<72x4xf32>
    %c7 = arith.constant 7 : index
    %c0_73 = arith.constant 0 : index
    %c0_74 = arith.constant 0 : index
    %582 = vector.load %arg2[%c7, %c0_73, %c0_74] : memref<9x8x72xf32, #tpu.memory_space<vmem>>, vector<1x8x72xf32>
    %583 = vector.shape_cast %582 : vector<1x8x72xf32> to vector<8x72xf32>
    %cst_75 = arith.constant dense<0.000000e+00> : vector<8x4xf32>
    %584 = tpu.matmul %583, %581, %cst_75 {dimension_numbers = #tpu.dot_dimension_numbers<[1], [0], [0], [1], [0, 0, 1, 1], [], []>} : vector<8x72xf32>, vector<72x4xf32>, vector<8x4xf32> -> vector<8x4xf32>
    %cst_76 = arith.constant 0.000000e+00 : f32
    %585 = vector.broadcast %cst_76 : f32 to vector<8x4xf32>
    %586 = arith.cmpf oge, %584, %585 : vector<8x4xf32>
    %cst_77 = arith.constant 0.00999999977 : f32
    %587 = vector.broadcast %cst_77 : f32 to vector<8x4xf32>
    %588 = arith.mulf %587, %584 : vector<8x4xf32>
    %589 = arith.select %586, %584, %588 : vector<8x4xi1>, vector<8x4xf32>
    %590 = vector.extract_strided_slice %589 {offsets = [0, 0], sizes = [8, 1], strides = [1, 1]} : vector<8x4xf32> to vector<8x1xf32>
    %591 = vector.extract_strided_slice %589 {offsets = [0, 0], sizes = [8, 3], strides = [1, 1]} : vector<8x4xf32> to vector<8x3xf32>
    %592 = tpu.concatenate %590, %591 in 1 : vector<8x1xf32>, vector<8x3xf32> -> vector<8x4xf32>
    %593 = vector.extract_strided_slice %589 {offsets = [0, 1], sizes = [8, 3], strides = [1, 1]} : vector<8x4xf32> to vector<8x3xf32>
    %594 = vector.extract_strided_slice %589 {offsets = [0, 3], sizes = [8, 1], strides = [1, 1]} : vector<8x4xf32> to vector<8x1xf32>
    %595 = tpu.concatenate %593, %594 in 1 : vector<8x3xf32>, vector<8x1xf32> -> vector<8x4xf32>
    %596 = vector.shape_cast %523 : vector<1x4xi1> to vector<1x4xi1>
    %597 = vector.broadcast %596 : vector<1x4xi1> to vector<8x4xi1>
    %598 = arith.select %597, %595, %592 : vector<8x4xi1>, vector<8x4xf32>
    %599 = vector.shape_cast %526 : vector<1x4xi1> to vector<1x4xi1>
    %600 = vector.broadcast %599 : vector<1x4xi1> to vector<8x4xi1>
    %601 = arith.select %600, %592, %595 : vector<8x4xi1>, vector<8x4xf32>
    %602 = vector.extract_strided_slice %598 {offsets = [0, 0], sizes = [8, 2], strides = [1, 1]} : vector<8x4xf32> to vector<8x2xf32>
    %603 = vector.extract_strided_slice %598 {offsets = [0, 0], sizes = [8, 2], strides = [1, 1]} : vector<8x4xf32> to vector<8x2xf32>
    %604 = tpu.concatenate %602, %603 in 1 : vector<8x2xf32>, vector<8x2xf32> -> vector<8x4xf32>
    %605 = vector.extract_strided_slice %598 {offsets = [0, 2], sizes = [8, 2], strides = [1, 1]} : vector<8x4xf32> to vector<8x2xf32>
    %606 = vector.extract_strided_slice %598 {offsets = [0, 2], sizes = [8, 2], strides = [1, 1]} : vector<8x4xf32> to vector<8x2xf32>
    %607 = tpu.concatenate %605, %606 in 1 : vector<8x2xf32>, vector<8x2xf32> -> vector<8x4xf32>
    %608 = vector.shape_cast %529 : vector<1x4xi1> to vector<1x4xi1>
    %609 = vector.broadcast %608 : vector<1x4xi1> to vector<8x4xi1>
    %610 = arith.select %609, %607, %604 : vector<8x4xi1>, vector<8x4xf32>
    %611 = vector.shape_cast %532 : vector<1x4xi1> to vector<1x4xi1>
    %612 = vector.broadcast %611 : vector<1x4xi1> to vector<8x4xi1>
    %613 = arith.select %612, %604, %607 : vector<8x4xi1>, vector<8x4xf32>
    %614 = vector.extract_strided_slice %589 {offsets = [0, 0], sizes = [8, 2], strides = [1, 1]} : vector<8x4xf32> to vector<8x2xf32>
    %615 = vector.extract_strided_slice %589 {offsets = [0, 0], sizes = [8, 2], strides = [1, 1]} : vector<8x4xf32> to vector<8x2xf32>
    %616 = tpu.concatenate %614, %615 in 1 : vector<8x2xf32>, vector<8x2xf32> -> vector<8x4xf32>
    %617 = vector.extract_strided_slice %589 {offsets = [0, 2], sizes = [8, 2], strides = [1, 1]} : vector<8x4xf32> to vector<8x2xf32>
    %618 = vector.extract_strided_slice %589 {offsets = [0, 2], sizes = [8, 2], strides = [1, 1]} : vector<8x4xf32> to vector<8x2xf32>
    %619 = tpu.concatenate %617, %618 in 1 : vector<8x2xf32>, vector<8x2xf32> -> vector<8x4xf32>
    %620 = vector.shape_cast %529 : vector<1x4xi1> to vector<1x4xi1>
    %621 = vector.broadcast %620 : vector<1x4xi1> to vector<8x4xi1>
    %622 = arith.select %621, %619, %616 : vector<8x4xi1>, vector<8x4xf32>
    %623 = vector.shape_cast %532 : vector<1x4xi1> to vector<1x4xi1>
    %624 = vector.broadcast %623 : vector<1x4xi1> to vector<8x4xi1>
    %625 = arith.select %624, %616, %619 : vector<8x4xi1>, vector<8x4xf32>
    %626 = vector.extract_strided_slice %601 {offsets = [0, 0], sizes = [8, 2], strides = [1, 1]} : vector<8x4xf32> to vector<8x2xf32>
    %627 = vector.extract_strided_slice %601 {offsets = [0, 0], sizes = [8, 2], strides = [1, 1]} : vector<8x4xf32> to vector<8x2xf32>
    %628 = tpu.concatenate %626, %627 in 1 : vector<8x2xf32>, vector<8x2xf32> -> vector<8x4xf32>
    %629 = vector.extract_strided_slice %601 {offsets = [0, 2], sizes = [8, 2], strides = [1, 1]} : vector<8x4xf32> to vector<8x2xf32>
    %630 = vector.extract_strided_slice %601 {offsets = [0, 2], sizes = [8, 2], strides = [1, 1]} : vector<8x4xf32> to vector<8x2xf32>
    %631 = tpu.concatenate %629, %630 in 1 : vector<8x2xf32>, vector<8x2xf32> -> vector<8x4xf32>
    %632 = vector.shape_cast %529 : vector<1x4xi1> to vector<1x4xi1>
    %633 = vector.broadcast %632 : vector<1x4xi1> to vector<8x4xi1>
    %634 = arith.select %633, %631, %628 : vector<8x4xi1>, vector<8x4xf32>
    %635 = vector.shape_cast %532 : vector<1x4xi1> to vector<1x4xi1>
    %636 = vector.broadcast %635 : vector<1x4xi1> to vector<8x4xi1>
    %637 = arith.select %636, %628, %631 : vector<8x4xi1>, vector<8x4xf32>
    %638 = tpu.concatenate %610, %622, %634, %598, %589, %601, %613, %625, %637 in 0 : vector<8x4xf32>, vector<8x4xf32>, vector<8x4xf32>, vector<8x4xf32>, vector<8x4xf32>, vector<8x4xf32>, vector<8x4xf32>, vector<8x4xf32>, vector<8x4xf32> -> vector<72x4xf32>
    %c8 = arith.constant 8 : index
    %c0_78 = arith.constant 0 : index
    %c0_79 = arith.constant 0 : index
    %639 = vector.load %arg2[%c8, %c0_78, %c0_79] : memref<9x8x72xf32, #tpu.memory_space<vmem>>, vector<1x8x72xf32>
    %640 = vector.shape_cast %639 : vector<1x8x72xf32> to vector<8x72xf32>
    %cst_80 = arith.constant dense<0.000000e+00> : vector<8x4xf32>
    %641 = tpu.matmul %640, %638, %cst_80 {dimension_numbers = #tpu.dot_dimension_numbers<[1], [0], [0], [1], [0, 0, 1, 1], [], []>} : vector<8x72xf32>, vector<72x4xf32>, vector<8x4xf32> -> vector<8x4xf32>
    %cst_81 = arith.constant 0.000000e+00 : f32
    %642 = vector.broadcast %cst_81 : f32 to vector<8x4xf32>
    %643 = arith.cmpf oge, %641, %642 : vector<8x4xf32>
    %cst_82 = arith.constant 0.00999999977 : f32
    %644 = vector.broadcast %cst_82 : f32 to vector<8x4xf32>
    %645 = arith.mulf %644, %641 : vector<8x4xf32>
    %646 = arith.select %643, %641, %645 : vector<8x4xi1>, vector<8x4xf32>
    %c0_83 = arith.constant 0 : index
    %c0_84 = arith.constant 0 : index
    %c0_85 = arith.constant 0 : index
    %647 = vector.load %arg7[%c0_83, %c0_84, %c0_85] : memref<1x8x4xf32, #tpu.memory_space<vmem>>, vector<1x8x4xf32>
    %648 = vector.shape_cast %647 : vector<1x8x4xf32> to vector<8x4xf32>
    %649 = vector.shape_cast %646 : vector<8x4xf32> to vector<1x8x4xf32>
    tpu.vector_store %arg7[%c0_83, %c0_84, %c0_85], %649 {strides = array<i32>} : memref<1x8x4xf32, #tpu.memory_space<vmem>>, vector<1x8x4xf32>,
    return
  }
  func.func @transform_0(%arg0: i32) -> (i32, i32, i32) {
    %c0_i32 = arith.constant 0 : i32
    %c0_i32_0 = arith.constant 0 : i32
    %c0_i32_1 = arith.constant 0 : i32
    return %arg0, %c0_i32, %c0_i32_0 : i32, i32, i32
  }
  func.func @transform_1(%arg0: i32) -> (i32, i32, i32) {
    %c0_i32 = arith.constant 0 : i32
    %c0_i32_0 = arith.constant 0 : i32
    %c0_i32_1 = arith.constant 0 : i32
    %c0_i32_2 = arith.constant 0 : i32
    return %c0_i32, %c0_i32_0, %c0_i32_1 : i32, i32, i32
  }
  func.func @transform_2(%arg0: i32) -> (i32, i32, i32) {
    %c0_i32 = arith.constant 0 : i32
    %c0_i32_0 = arith.constant 0 : i32
    %c0_i32_1 = arith.constant 0 : i32
    %c0_i32_2 = arith.constant 0 : i32
    return %c0_i32, %c0_i32_0, %c0_i32_1 : i32, i32, i32
  }
  func.func @transform_3(%arg0: i32) -> (i32, i32, i32) {
    %c0_i32 = arith.constant 0 : i32
    %c0_i32_0 = arith.constant 0 : i32
    %c0_i32_1 = arith.constant 0 : i32
    return %arg0, %c0_i32, %c0_i32_0 : i32, i32, i32
  }
  func.func @transform_4(%arg0: i32) -> (i32, i32, i32) {
    %c0_i32 = arith.constant 0 : i32
    %c0_i32_0 = arith.constant 0 : i32
    %c0_i32_1 = arith.constant 0 : i32
    return %arg0, %c0_i32, %c0_i32_0 : i32, i32, i32
  }
  func.func @transform_5(%arg0: i32) -> (i32, i32, i32) {
    %c0_i32 = arith.constant 0 : i32
    %c0_i32_0 = arith.constant 0 : i32
    %c0_i32_1 = arith.constant 0 : i32
    return %arg0, %c0_i32, %c0_i32_0 : i32, i32, i32
  }
  func.func @transform_6(%arg0: i32) -> (i32, i32, i32) {
    %c0_i32 = arith.constant 0 : i32
    %c0_i32_0 = arith.constant 0 : i32
    %c0_i32_1 = arith.constant 0 : i32
    return %arg0, %c0_i32, %c0_i32_0 : i32, i32, i32
  }
}

</mosaic_0001>

<bundles_post_ra>
// kernel: analyzer_forward.1
= control target key start
LH: loop header
LB: loop body
LE: loop exit
PB: predicated region body
PF: predicated region fallthrough
CT: control target
= control target key end

     0   :  { %s2955_s21 = smov 0   ;;  %s3742_s0 = inlined_call_operand.vmem [shape: f32[2,8,256], index: 0, kind: input, shape index: {}]   ;;  %s3743_s1 = inlined_call_operand.vmem [shape: f32[9,8,72], index: 1, kind: input, shape index: {}]   ;;  %s3744_s2 = inlined_call_operand.vmem [shape: f32[4,4,256], index: 2, kind: input, shape index: {}]   ;;  %s3745_s3 = inlined_call_operand.vmem [shape: f32[2,8,256], index: 3, kind: output, shape index: {0}]   ;;  %s3746_s4 = inlined_call_operand.vmem [shape: f32[2,8,64], index: 4, kind: output, shape index: {1}]   ;;  %s3747_s5 = inlined_call_operand.vmem [shape: f32[2,8,16], index: 5, kind: output, shape index: {2}]   ;;  %s3748_s6 = inlined_call_operand.vmem [shape: f32[2,8,4], index: 6, kind: output, shape index: {3}]  }
   0x1 LB: > { %s2321_s22 = sadd.s32 4294967295, %s2893_s21   ;;  %p2325_p0 = scmp.ge.s32.totalorder %s2893_s21, 1  ;;  %s2893_s21 = sphi %s2955_s21, %s17_s21  }
   0x2   : > { %p219_p1 = scmp.lt.s32.totalorder %s2893_s21, 3 }
   0x4   : > { %p220_p2 = pnand %p2325_p0, %p219_p1 }
   0x5   : > { %p261_p3 = scmp.lt.s32.totalorder (!%p220_p2), %s2321_s22, 1  ;;  %s2895_s27 = smov (!%p220_p2), 127   ;;  %v308_v3 = vlaneseq (!%p220_p2)  ;;  %v285_v4 = vld [vmem:[%s3744_s2] sm:$0xff] (!%p220_p2)  ;;  %v2898_v8 = vmov (!%p220_p2), 0   ;;  %vm293_vm1 = vcmask (!%p220_p2), 7168   ;;  %vm302_vm2 = vcmask (!%p220_p2), 1039360  }
   0x6   : > { %223 = sbr.rel (%p220_p2) target bundleno = 6347 (0x18cb), region = 32  ;;  %s2896_s28 = smov (!%p220_p2), 1   ;;  %vm286_vm0 = vcmp.gt.f32.partialorder (!%p220_p2), %v285_v4, 0.5  ;;  %v2900_v37 = vmov (!%p220_p2), 0.0   ;;  %vm354_vm7 = vcmask (!%p220_p2), 130048   ;;  %vm363_vm8 = vcmask (!%p220_p2), 916480  }
   0x7   : > { %s2897_s29 = smov (!%p220_p2), 16   ;;  %v2990_v5 = vshrl.u32 (!%p220_p2), %v308_v3, 7  ;;  %v2997_v9 = vsel (!%p220_p2), %vm286_vm0, 1, %v2898_v8  ;;  %s2899_s8 = smov (!%p220_p2), 112   ;;  %519 = vmatprep.mubr.f32.mxu0 (!%p220_p2), %v2900_v37  ;;  %681 = vmatprep.mubr.f32.mxu1 (!%p220_p2), %v2900_v37  ;;  %vm451_vm13 = vcmask (!%p220_p2), 588800  }
   0x8   : > { %s2901_s18 = smov (!%p220_p2), 64   ;;  %s2902_s19 = smov (!%p220_p2), 96  }
   0x9   : > { %v2993_v6 = vsub.s32 (!%p220_p2), 0, %v2990_v5  ;;  %v314_v7 = vsub.s32 (!%p220_p2), 4, %v2990_v5  ;;  %v3003_v12 = vsub.s32 (!%p220_p2), 1, %v2990_v5  ;;  %v334_v18 = vsub.s32 (!%p220_p2), 5, %v2990_v5  ;;  %s2903_s20 = smov (!%p220_p2), 32   ;;  %s2906_s24 = smov (!%p220_p2), 24  }
   0xa   : > { %v374_v38 = vsub.s32 (!%p220_p2), 6, %v2990_v5  ;;  %v3070_v39 = vsub.s32 (!%p220_p2), 2, %v2990_v5  ;;  %v394_v55 = vsub.s32 (!%p220_p2), 7, %v2990_v5  ;;  %s2907_s25 = smov (!%p220_p2), 40   ;;  %s2909_s30 = smov (!%p220_p2), 48  }
   0xb   : > { %v311_v10 = vrot.slane (!%p220_p2), %v2997_v9, %v2993_v6  ;;  %v315_v11 = vrot.slane (!%p220_p2), %v2997_v9, %v314_v7  ;;  %v331_v17 = vrot.slane (!%p220_p2), %v2997_v9, %v3003_v12  ;;  %v335_v23 = vrot.slane (!%p220_p2), %v2997_v9, %v334_v18  ;;  %s2911_s9 = smov (!%p220_p2), 120   ;;  %s2919_s13 = smov (!%p220_p2), 126  }
   0xc   : > { %v375_v40 = vrot.slane (!%p220_p2), %v2997_v9, %v374_v38  ;;  %v371_v45 = vrot.slane (!%p220_p2), %v2997_v9, %v3070_v39  ;;  %v3096_v7 = vsub.s32 (!%p220_p2), 3, %v2990_v5 }
   0xd   : > { %s3784_s22 = smov (!%p261_p3, %s2321_s22), 1  ;;  %v3006_v13 = vrot.slane %v311_v10, %v2993_v6  ;;  %v323_v14 = vrot.slane %v315_v11, %v2993_v6  ;;  %v3018_v22 = vrot.slane %v331_v17, %v3003_v12  ;;  %v343_v32 = vrot.slane %v335_v23, %v3003_v12 }
   0xe   : > { %s2375_s23 = sshll.u32 %s3784_s22, 4  ;;  %v383_v44 = vrot.slane %v375_v40, %v3070_v39  ;;  %v3082_v50 = vrot.slane %v371_v45, %v3070_v39  ;;  %v395_v10 = vrot.slane %v2997_v9, %v394_v55  ;;  %s3479_s14 = sshll.u32 %s3784_s22, 3 }
   0xf   : > { %s265_s26 = scalar_lea.vmem %s3742_s0, %s2375_s23  ;;  %vm324_vm3 = vcmp.eq.s32.totalorder %v3006_v13, 1  ;;  %vm3013_vm4 = vcmp.eq.s32.totalorder %v323_v14, 1  ;;  %vm344_vm5 = vcmp.eq.s32.totalorder %v3018_v22, 1  ;;  %vm3052_vm6 = vcmp.eq.s32.totalorder %v343_v32, 1  ;;  %s270_s17 = scalar_lea.vmem %s3745_s3, %s2375_s23 }
  0x10   : > { %v2971_v0 = vld [vmem:[%s265_s26] sm:$0xff]  ;;  %v2977_v1 = vld [vmem:[%s265_s26 + $0x8] sm:$0xff]  ;;  %vm3076_vm9 = vcmp.eq.s32.totalorder %v383_v44, 1  ;;  %vm384_vm10 = vcmp.eq.s32.totalorder %v3082_v50, 1  ;;  %s2905_s23 = smov 8   ;;  %s2908_s26 = smov 56  }
  0x11   : > { %298 = vrot.lane.b32.xlu1 %v2971_v0, %s2895_s27  ;;  %289 = vrot.lane.b32.xlu0 %v2971_v0, %s2896_s28  ;;  %v2767_v2 = vpack.i.bf16 %v2977_v1, %v2971_v0  ;;  %s2913_s22 = smov 80   ;;  %s278_s10 = scalar_lea.vmem %s3747_s5, %s3479_s14 }
  0x15   : > { %300 = vrot.lane.b32.xlu1 %v2977_v1, %s2895_s27  ;;  %291 = vrot.lane.b32.xlu0 %v2977_v1, %s2896_s28 }
  0x19   : > { %2768 = vrot.lane.b32.xlu0 %v2767_v2, %s2897_s29 }
  0x83   : > { %v299_v15 = vpop.permute.xlu1 %298  ;;  %v290_v16 = vpop.permute.xlu0 %289 }
  0x84   : > { %v297_v24 = vsel %vm293_vm1, %v2971_v0, %v290_v16 }
  0x87   : > { %v301_v20 = vpop.permute.xlu1 %300  ;;  %v292_v21 = vpop.permute.xlu0 %291 }
  0x88   : > { %v303_v25 = vsel %vm302_vm2, %v299_v15, %v301_v20  ;;  %v306_v26 = vsel %vm302_vm2, %v301_v20, %v2977_v1  ;;  %v294_v27 = vsel %vm293_vm1, %v290_v16, %v292_v21 }
  0x89   : > { %v3029_v28 = vsel %vm324_vm3, %v303_v25, %v297_v24  ;;  %v3033_v29 = vsel %vm3013_vm4, %v306_v26, %v294_v27  ;;  %v3047_v34 = vsel %vm344_vm5, %v297_v24, %v303_v25  ;;  %v3058_v36 = vsel %vm3052_vm6, %v294_v27, %v306_v26 }
  0x8a   : > { %v2777_v30 = vpack.i.bf16 %v2977_v1, %v3033_v29  ;;  %v2772_v31 = vpack.i.bf16 %v3033_v29, %v3029_v28  ;;  %v2782_v33 = vpack.i.bf16 %v2971_v0, %v3029_v28  ;;  %v391_v26 = vrot.slane %v2997_v9, %v3096_v7 }
  0x8b   : > { %v2769_v41 = vpop.permute.xlu0 %2768  ;;  %v2620_v45 = vpack.c.bf16 %v3047_v34, %v2971_v0 }
  0x8c   : > { %2778 = vrot.lane.b32.xlu1 %v2777_v30, %s2899_s8  ;;  %2773 = vrot.lane.b32.xlu0 %v2772_v31, %s2897_s29  ;;  %v2771_v42 = vunpack.i.h.bf16 %v2769_v41  ;;  %v2770_v43 = vunpack.i.l.bf16 %v2769_v41  ;;  %v403_v30 = vrot.slane %v395_v10, %v3096_v7  ;;  %v3122_v40 = vrot.slane %v391_v26, %v3096_v7 }
  0x8e   : > { %v412_v49 = vsel %vm354_vm7, %v2770_v43, %v2771_v42  ;;  %v415_v15 = vsel %vm354_vm7, %v2971_v0, %v2770_v43  ;;  %vm3126_vm11 = vcmp.eq.s32.totalorder %v403_v30, 1  ;;  %vm404_vm12 = vcmp.eq.s32.totalorder %v3122_v40, 1 }
  0x90   : > { %2783 = vrot.lane.b32.xlu1 %v2782_v33, %s2899_s8  ;;  %430 = vrot.lane.b32.xlu0 %v3047_v34, %s2897_s29 }
  0x94   : > { %432 = vrot.lane.b32.xlu1 %v3058_v36, %s2897_s29  ;;  %440 = vrot.lane.b32.xlu0 %v3058_v36, %s2899_s8 }
  0x98   : > { %438 = vrot.lane.b32.xlu1 %v3047_v34, %s2899_s8 }
  0xfe   : > { %v2779_v46 = vpop.permute.xlu1 %2778  ;;  %v2774_v47 = vpop.permute.xlu0 %2773 }
  0xff   : > { %v2781_v51 = vunpack.i.h.bf16 %v2779_v46  ;;  %v2780_v52 = vunpack.i.l.bf16 %v2779_v46  ;;  %v2776_v53 = vunpack.i.h.bf16 %v2774_v47  ;;  %v2775_v54 = vunpack.i.l.bf16 %v2774_v47 }
 0x101   : > { %v355_v56 = vsel %vm354_vm7, %v2775_v54, %v2776_v53  ;;  %v367_v57 = vsel %vm363_vm8, %v2780_v52, %v3033_v29  ;;  %v423_v58 = vsel %vm363_vm8, %v2781_v51, %v2977_v1  ;;  %v358_v11 = vsel %vm354_vm7, %v3029_v28, %v2775_v54 }
 0x102   : > { %v2784_v59 = vpop.permute.xlu1 %2783  ;;  %v431_v60 = vpop.permute.xlu0 %430  ;;  %v387_v61 = vsel %vm3076_vm9, %v367_v57, %v355_v56  ;;  %v425_v62 = vsel %vm3076_vm9, %v423_v58, %v412_v49  ;;  %v407_v43 = vsel %vm3126_vm11, %v355_v56, %v367_v57  ;;  %v427_v44 = vsel %vm3126_vm11, %v412_v49, %v423_v58  ;;  %v450_v49 = vld [vmem:[%s3743_s1] sm:$0xff] }
 0x103   : > { %v2786_v63 = vunpack.i.h.bf16 %v2784_v59  ;;  %v2785_v2 = vunpack.i.l.bf16 %v2784_v59  ;;  %v2610_v4 = vpack.c.bf16 %v425_v62, %v387_v61  ;;  %v437_v33 = vsel %vm354_vm7, %v3047_v34, %v431_v60 }
 0x104   : > { %v2622_v46 = vpack.c.bf16 %v427_v44, %v407_v43 }
 0x105   : > { %2611 = vmatprep.subr.bf16.mxu0 %v2610_v4  ;;  %v364_v14 = vsel %vm363_vm8, %v2785_v2, %v2780_v52  ;;  %v420_v16 = vsel %vm363_vm8, %v2786_v63, %v2781_v51 }
 0x106   : > { %v433_v17 = vpop.permute.xlu1 %432  ;;  %v441_v18 = vpop.permute.xlu0 %440  ;;  %v386_v20 = vsel %vm384_vm10, %v364_v14, %v358_v11  ;;  %v424_v21 = vsel %vm384_vm10, %v420_v16, %v415_v15 }
 0x107   : > { %v434_v23 = vsel %vm354_vm7, %v431_v60, %v433_v17  ;;  %v445_v24 = vsel %vm363_vm8, %v441_v18, %v3058_v36  ;;  %v2612_v25 = vpack.c.bf16 %v424_v21, %v386_v20 }
 0x108   : > { %v447_v27 = vsel %vm3076_vm9, %v445_v24, %v434_v23  ;;  %v449_v47 = vsel %vm3126_vm11, %v434_v23, %v445_v24 }
 0x109   : > { %2613 = vmatpush1.bf16.msra.mxu0 %v2612_v25  ;;  %v2614_v31 = vpack.c.bf16 %v3033_v29, %v447_v27  ;;  %v2618_v29 = vpack.c.bf16 %v3058_v36, %v2977_v1  ;;  %v426_v1 = vsel %vm404_vm12, %v415_v15, %v420_v16 }
 0x10a   : > { %v439_v32 = vpop.permute.xlu1 %438 }
 0x10b   : > { %v442_v38 = vsel %vm363_vm8, %v439_v32, %v441_v18  ;;  %2615 = vmatprep.subr.bf16.mxu0 %v2614_v31 }
 0x10c   : > { %v446_v9 = vsel %vm384_vm10, %v442_v38, %v437_v33  ;;  %v448_v0 = vsel %vm404_vm12, %v437_v33, %v442_v38 }
 0x10d   : > { %v2616_v42 = vpack.c.bf16 %v3029_v28, %v446_v9  ;;  %v406_v28 = vsel %vm404_vm12, %v358_v11, %v364_v14 }
 0x10e   : > { %v2624_v36 = vpack.c.bf16 %v426_v1, %v406_v28 }
 0x10f   : > { %2617 = vmatpush1.bf16.msra.mxu0 %v2616_v42 }
 0x110   : > { %2619 = vmatprep.subr.bf16.mxu0 %v2618_v29 }
 0x113   : > { %2621 = vmatpush1.bf16.msra.mxu0 %v2620_v45 }
 0x114   : > { %2623 = vmatprep.subr.bf16.mxu0 %v2622_v46 }
 0x117   : > { %2625 = vmatpush1.bf16.msra.mxu0 %v2624_v36 }
 0x118   : > { %471 = vmatprep.subr.mxu0 %v449_v47 }
 0x11b   : > { %472 = vmatpush1.msra.mxu0 %v448_v0 }
 0x11c   : > { %2333 = vmatmul.mubr.msk.f32.vlgmr.msra.gmra.mrb[0].mxu0 %vm451_vm13, %v450_v49 }
 0x11d   : > { %843 = vmatprep.mubr.f32.mxu0 %v2900_v37 }
 0x1ef   : > { %v3153_v34 = vpop.f32.mrb[0].mxu0 }
 0x1f0   : > { %528 = vrot.lane.b32.xlu0 %v3153_v34, %s2896_s28  ;;  %v3157_v51 = vpop.f32.mrb[1].mxu0 }
 0x1f1   : > { %530 = vrot.lane.b32.xlu1 %v3157_v51, %s2896_s28  ;;  %v2787_v52 = vpack.i.bf16 %v3157_v51, %v3153_v34 }
 0x1f4   : > { %536 = vrot.lane.b32.xlu0 %v3153_v34, %s2895_s27 }
 0x1f5   : > { %538 = vrot.lane.b32.xlu1 %v3157_v51, %s2895_s27 }
 0x1f8   : > { %2788 = vrot.lane.b32.xlu0 %v2787_v52, %s2897_s29 }
 0x262   : > { %v529_v53 = vpop.permute.xlu0 %528 }
 0x263   : > { %v531_v54 = vpop.permute.xlu1 %530  ;;  %v535_v57 = vsel %vm293_vm1, %v3153_v34, %v529_v53 }
 0x264   : > { %v532_v58 = vsel %vm293_vm1, %v529_v53, %v531_v54 }
 0x266   : > { %v537_v55 = vpop.permute.xlu0 %536 }
 0x267   : > { %v539_v56 = vpop.permute.xlu1 %538 }
 0x268   : > { %v540_v59 = vsel %vm302_vm2, %v537_v55, %v539_v56  ;;  %v543_v60 = vsel %vm302_vm2, %v539_v56, %v3157_v51 }
 0x269   : > { %v544_v61 = vsel %vm324_vm3, %v540_v59, %v535_v57  ;;  %v545_v62 = vsel %vm3013_vm4, %v543_v60, %v532_v58  ;;  %v546_v10 = vsel %vm344_vm5, %v535_v57, %v540_v59  ;;  %v547_v11 = vsel %vm3052_vm6, %v532_v58, %v543_v60 }
 0x26a   : > { %v2797_v63 = vpack.i.bf16 %v3157_v51, %v545_v62  ;;  %v2792_v2 = vpack.i.bf16 %v545_v62, %v544_v61  ;;  %v2802_v4 = vpack.i.bf16 %v3153_v34, %v544_v61  ;;  %v2789_v14 = vpop.permute.xlu0 %2788  ;;  %v2634_v60 = vpack.c.bf16 %v547_v11, %v3157_v51 }
 0x26b   : > { %v2791_v15 = vunpack.i.h.bf16 %v2789_v14  ;;  %v2790_v16 = vunpack.i.l.bf16 %v2789_v14 }
 0x26c   : > { %2798 = vrot.lane.b32.xlu1 %v2797_v63, %s2899_s8  ;;  %2793 = vrot.lane.b32.xlu0 %v2792_v2, %s2897_s29 }
 0x26d   : > { %v574_v27 = vsel %vm354_vm7, %v2790_v16, %v2791_v15  ;;  %v577_v45 = vsel %vm354_vm7, %v3153_v34, %v2790_v16 }
 0x270   : > { %2803 = vrot.lane.b32.xlu1 %v2802_v4, %s2899_s8  ;;  %592 = vrot.lane.b32.xlu0 %v546_v10, %s2897_s29 }
 0x274   : > { %594 = vrot.lane.b32.xlu1 %v547_v11, %s2897_s29  ;;  %602 = vrot.lane.b32.xlu0 %v547_v11, %s2899_s8 }
 0x278   : > { %600 = vrot.lane.b32.xlu1 %v546_v10, %s2899_s8 }
 0x2de   : > { %v2799_v17 = vpop.permute.xlu1 %2798  ;;  %v2794_v18 = vpop.permute.xlu0 %2793 }
 0x2df   : > { %v2801_v20 = vunpack.i.h.bf16 %v2799_v17  ;;  %v2800_v21 = vunpack.i.l.bf16 %v2799_v17  ;;  %v2796_v23 = vunpack.i.h.bf16 %v2794_v18  ;;  %v2795_v24 = vunpack.i.l.bf16 %v2794_v18 }
 0x2e1   : > { %v554_v25 = vsel %vm354_vm7, %v2795_v24, %v2796_v23  ;;  %v565_v26 = vsel %vm363_vm8, %v2800_v21, %v545_v62  ;;  %v585_v30 = vsel %vm363_vm8, %v2801_v20, %v3157_v51  ;;  %v557_v43 = vsel %vm354_vm7, %v544_v61, %v2795_v24 }
 0x2e2   : > { %v2804_v31 = vpop.permute.xlu1 %2803  ;;  %v593_v32 = vpop.permute.xlu0 %592  ;;  %v567_v33 = vsel %vm3076_vm9, %v565_v26, %v554_v25  ;;  %v587_v38 = vsel %vm3076_vm9, %v585_v30, %v574_v27  ;;  %v569_v63 = vsel %vm3126_vm11, %v554_v25, %v565_v26  ;;  %v589_v2 = vsel %vm3126_vm11, %v574_v27, %v585_v30 }
 0x2e3   : > { %v2806_v9 = vunpack.i.h.bf16 %v2804_v31  ;;  %v2805_v42 = vunpack.i.l.bf16 %v2804_v31  ;;  %v2626_v29 = vpack.c.bf16 %v587_v38, %v567_v33  ;;  %v599_v56 = vsel %vm354_vm7, %v546_v10, %v593_v32 }
 0x2e4   : > { %v2638_v4 = vpack.c.bf16 %v589_v2, %v569_v63 }
 0x2e5   : > { %2627 = vmatprep.subr.bf16.mxu1 %v2626_v29  ;;  %v562_v44 = vsel %vm363_vm8, %v2805_v42, %v2800_v21  ;;  %v582_v46 = vsel %vm363_vm8, %v2806_v9, %v2801_v20 }
 0x2e6   : > { %v595_v28 = vpop.permute.xlu1 %594  ;;  %v603_v1 = vpop.permute.xlu0 %602  ;;  %v566_v36 = vsel %vm384_vm10, %v562_v44, %v557_v43  ;;  %v586_v47 = vsel %vm384_vm10, %v582_v46, %v577_v45  ;;  %v568_v14 = vsel %vm404_vm12, %v557_v43, %v562_v44  ;;  %v588_v15 = vsel %vm404_vm12, %v577_v45, %v582_v46 }
 0x2e7   : > { %v596_v49 = vsel %vm354_vm7, %v593_v32, %v595_v28  ;;  %v607_v0 = vsel %vm363_vm8, %v603_v1, %v547_v11  ;;  %v2628_v52 = vpack.c.bf16 %v586_v47, %v566_v36  ;;  %v2640_v51 = vpack.c.bf16 %v588_v15, %v568_v14  ;;  %v2334_v11 = vld [vmem:[%s3743_s1 + $0x8] sm:$0xff] }
 0x2e8   : > { %v609_v53 = vsel %vm3076_vm9, %v607_v0, %v596_v49 }
 0x2e9   : > { %2629 = vmatpush1.bf16.msra.mxu1 %v2628_v52  ;;  %v2630_v54 = vpack.c.bf16 %v545_v62, %v609_v53  ;;  %v2636_v62 = vpack.c.bf16 %v546_v10, %v3153_v34 }
 0x2ea   : > { %v601_v55 = vpop.permute.xlu1 %600 }
 0x2eb   : > { %v604_v57 = vsel %vm363_vm8, %v601_v55, %v603_v1  ;;  %2631 = vmatprep.subr.bf16.mxu1 %v2630_v54 }
 0x2ec   : > { %v608_v58 = vsel %vm384_vm10, %v604_v57, %v599_v56  ;;  %v610_v34 = vsel %vm404_vm12, %v599_v56, %v604_v57 }
 0x2ed   : > { %v2632_v59 = vpack.c.bf16 %v544_v61, %v608_v58  ;;  %v611_v61 = vsel %vm3126_vm11, %v596_v49, %v607_v0 }
 0x2ef   : > { %2633 = vmatpush1.bf16.msra.mxu1 %v2632_v59 }
 0x2f0   : > { %2635 = vmatprep.subr.bf16.mxu1 %v2634_v60 }
 0x2f3   : > { %2637 = vmatpush1.bf16.msra.mxu1 %v2636_v62 }
 0x2f4   : > { %2639 = vmatprep.subr.bf16.mxu1 %v2638_v4 }
 0x2f7   : > { %2641 = vmatpush1.bf16.msra.mxu1 %v2640_v51 }
 0x2f8   : > { %633 = vmatprep.subr.mxu1 %v611_v61 }
 0x2fb   : > { %634 = vmatpush1.msra.mxu1 %v610_v34 }
 0x2fc   : > { %2335 = vmatmul.mubr.msk.f32.vlgmr.msra.gmra.mrb[0].mxu1 %vm451_vm13, %v2334_v11 }
 0x3cf   : > { %v3235_v10 = vpop.f32.mrb[0].mxu1 }
 0x3d0   : > { %690 = vrot.lane.b32.xlu0 %v3235_v10, %s2896_s28  ;;  %v3239_v16 = vpop.f32.mrb[1].mxu1 }
 0x3d1   : > { %692 = vrot.lane.b32.xlu1 %v3239_v16, %s2896_s28  ;;  %v2807_v17 = vpack.i.bf16 %v3239_v16, %v3235_v10 }
 0x3d4   : > { %698 = vrot.lane.b32.xlu0 %v3235_v10, %s2895_s27 }
 0x3d5   : > { %700 = vrot.lane.b32.xlu1 %v3239_v16, %s2895_s27 }
 0x3d8   : > { %2808 = vrot.lane.b32.xlu0 %v2807_v17, %s2897_s29 }
 0x442   : > { %v691_v18 = vpop.permute.xlu0 %690 }
 0x443   : > { %v693_v20 = vpop.permute.xlu1 %692  ;;  %v697_v24 = vsel %vm293_vm1, %v3235_v10, %v691_v18 }
 0x444   : > { %v694_v25 = vsel %vm293_vm1, %v691_v18, %v693_v20 }
 0x446   : > { %v699_v21 = vpop.permute.xlu0 %698 }
 0x447   : > { %v701_v23 = vpop.permute.xlu1 %700 }
 0x448   : > { %v702_v26 = vsel %vm302_vm2, %v699_v21, %v701_v23  ;;  %v705_v27 = vsel %vm302_vm2, %v701_v23, %v3239_v16  ;;  %vm908_vm2 = vcmask 121856  }
 0x449   : > { %v706_v30 = vsel %vm324_vm3, %v702_v26, %v697_v24  ;;  %v707_v31 = vsel %vm3013_vm4, %v705_v27, %v694_v25  ;;  %v708_v9 = vsel %vm344_vm5, %v697_v24, %v702_v26  ;;  %v709_v13 = vsel %vm3052_vm6, %v694_v25, %v705_v27 }
 0x44a   : > { %v2817_v32 = vpack.i.bf16 %v3239_v16, %v707_v31  ;;  %v2812_v33 = vpack.i.bf16 %v707_v31, %v706_v30  ;;  %v2822_v38 = vpack.i.bf16 %v3235_v10, %v706_v30  ;;  %v2809_v19 = vpop.permute.xlu0 %2808  ;;  %v2650_v23 = vpack.c.bf16 %v709_v13, %v3239_v16 }
 0x44b   : > { %v2811_v42 = vunpack.i.h.bf16 %v2809_v19  ;;  %v2810_v29 = vunpack.i.l.bf16 %v2809_v19  ;;  %v2652_v25 = vpack.c.bf16 %v708_v9, %v3235_v10  ;;  %vm1094_vm3 = vcmask 64512  }
 0x44c   : > { %2818 = vrot.lane.b32.xlu1 %v2817_v32, %s2899_s8  ;;  %2813 = vrot.lane.b32.xlu0 %v2812_v33, %s2897_s29  ;;  %vm1097_vm4 = vcmask 195584   ;;  %vm1099_vm5 = vcmask 261120   ;;  %vm1101_vm6 = vcmask 326656  }
 0x44d   : > { %v736_v1 = vsel %vm354_vm7, %v2810_v29, %v2811_v42  ;;  %v739_v57 = vsel %vm354_vm7, %v3235_v10, %v2810_v29  ;;  %v927_v42 = vadd.s32 8, %v2990_v5  ;;  %v929_v29 = vand.u32 127, %v308_v3 }
 0x450   : > { %2823 = vrot.lane.b32.xlu1 %v2822_v38, %s2899_s8  ;;  %754 = vrot.lane.b32.xlu0 %v708_v9, %s2897_s29 }
 0x454   : > { %756 = vrot.lane.b32.xlu1 %v709_v13, %s2897_s29  ;;  %764 = vrot.lane.b32.xlu0 %v709_v13, %s2899_s8 }
 0x458   : > { %762 = vrot.lane.b32.xlu1 %v708_v9, %s2899_s8 }
 0x4be   : > { %v2819_v43 = vpop.permute.xlu1 %2818  ;;  %v2814_v44 = vpop.permute.xlu0 %2813 }
 0x4bf   : > { %v2821_v22 = vunpack.i.h.bf16 %v2819_v43  ;;  %v2820_v45 = vunpack.i.l.bf16 %v2819_v43  ;;  %v2816_v46 = vunpack.i.h.bf16 %v2814_v44  ;;  %v2815_v28 = vunpack.i.l.bf16 %v2814_v44 }
 0x4c0   : > { %v930_v43 = vmul.u32 2, %v929_v29 }
 0x4c1   : > { %v747_v35 = vsel %vm363_vm8, %v2821_v22, %v3239_v16  ;;  %v727_v36 = vsel %vm363_vm8, %v2820_v45, %v707_v31  ;;  %v716_v47 = vsel %vm354_vm7, %v2815_v28, %v2816_v46  ;;  %v719_v58 = vsel %vm354_vm7, %v706_v30, %v2815_v28 }
 0x4c2   : > { %v2824_v49 = vpop.permute.xlu1 %2823  ;;  %v755_v0 = vpop.permute.xlu0 %754  ;;  %v729_v52 = vsel %vm3076_vm9, %v727_v36, %v716_v47  ;;  %v749_v53 = vsel %vm3076_vm9, %v747_v35, %v736_v1  ;;  %v731_v24 = vsel %vm3126_vm11, %v716_v47, %v727_v36  ;;  %v751_v48 = vsel %vm3126_vm11, %v736_v1, %v747_v35 }
 0x4c3   : > { %v2826_v54 = vunpack.i.h.bf16 %v2824_v49  ;;  %v2825_v55 = vunpack.i.l.bf16 %v2824_v49  ;;  %v2642_v56 = vpack.c.bf16 %v749_v53, %v729_v52  ;;  %v761_v17 = vsel %vm354_vm7, %v708_v9, %v755_v0 }
 0x4c4   : > { %v2654_v26 = vpack.c.bf16 %v751_v48, %v731_v24  ;;  %vm3332_vm14 = vcmp.eq.s32.totalorder %v2990_v5, %v930_v43  ;;  %vm932_vm15 = vcmp.eq.s32.totalorder %v927_v42, %v930_v43  ;;  %v2910_v43 = vmov 0.0|0.0  }
 0x4c5   : > { %v744_v59 = vsel %vm363_vm8, %v2826_v54, %v2821_v22  ;;  %v724_v60 = vsel %vm363_vm8, %v2825_v55, %v2820_v45  ;;  %2643 = vmatprep.subr.bf16.mxu0 %v2642_v56  ;;  %vm2658_vm0 = vmpackc.low %vm932_vm15, %vm3332_vm14  ;;  %v2904_v22 = vmov 1.0|1.0  }
 0x4c6   : > { %v757_v63 = vpop.permute.xlu1 %756  ;;  %v765_v2 = vpop.permute.xlu0 %764  ;;  %v728_v62 = vsel %vm384_vm10, %v724_v60, %v719_v58  ;;  %v748_v4 = vsel %vm384_vm10, %v744_v59, %v739_v57  ;;  %v730_v27 = vsel %vm404_vm12, %v719_v58, %v724_v60  ;;  %v750_v50 = vsel %vm404_vm12, %v739_v57, %v744_v59  ;;  %2659 = vmatprep.subr.msk.bf16.mxu1 %vm2658_vm0, %v2904_v22 }
 0x4c7   : > { %v758_v14 = vsel %vm354_vm7, %v755_v0, %v757_v63  ;;  %v769_v15 = vsel %vm363_vm8, %v765_v2, %v709_v13  ;;  %v2644_v51 = vpack.c.bf16 %v748_v4, %v728_v62  ;;  %v2656_v16 = vpack.c.bf16 %v750_v50, %v730_v27  ;;  %2661 = vmatpush3.bf16.msk.msra.mxu1 %vm2658_vm0, %v2904_v22 }
 0x4c8   : > { %v771_v61 = vsel %vm3076_vm9, %v769_v15, %v758_v14  ;;  %vm1105_vm9 = vcmask 457728   ;;  %2662 = vmatprep.subr.bf16.mxu1 %v2910_v43  ;;  %vm2912_vm0 = vmmov 0  }
 0x4c9   : > { %2645 = vmatpush1.bf16.msra.mxu0 %v2644_v51  ;;  %v2646_v11 = vpack.c.bf16 %v707_v31, %v771_v61  ;;  %v2336_v31 = vld [vmem:[%s3743_s1 + $0x10] sm:$0xff] }
 0x4ca   : > { %v763_v34 = vpop.permute.xlu1 %762 }
 0x4cb   : > { %v766_v18 = vsel %vm363_vm8, %v763_v34, %v765_v2  ;;  %2647 = vmatprep.subr.bf16.mxu0 %v2646_v11 }
 0x4cc   : > { %v770_v20 = vsel %vm384_vm10, %v766_v18, %v761_v17  ;;  %v772_v10 = vsel %vm404_vm12, %v761_v17, %v766_v18 }
 0x4cd   : > { %v2648_v21 = vpack.c.bf16 %v706_v30, %v770_v20  ;;  %v773_v30 = vsel %vm3126_vm11, %v758_v14, %v769_v15  ;;  %vm1118_vm11 = vcmask 515072  }
 0x4cf   : > { %2649 = vmatpush1.bf16.msra.mxu0 %v2648_v21 }
 0x4d0   : > { %2651 = vmatprep.subr.bf16.mxu0 %v2650_v23 }
 0x4d3   : > { %2653 = vmatpush1.bf16.msra.mxu0 %v2652_v25 }
 0x4d4   : > { %2655 = vmatprep.subr.bf16.mxu0 %v2654_v26 }
 0x4d7   : > { %2657 = vmatpush1.bf16.msra.mxu0 %v2656_v16 }
 0x4d8   : > { %795 = vmatprep.subr.mxu0 %v773_v30 }
 0x4db   : > { %796 = vmatpush1.msra.mxu0 %v772_v10 }
 0x4dc   : > { %2337 = vmatmul.mubr.msk.f32.vlgmr.msra.gmra.mrb[2].mxu0 %vm451_vm13, %v2336_v31  ;;  %2674 = vmatprep.subr.bf16.mxu0 %v2910_v43 }
 0x4dd   : > { %2510 = vmatprep.mubr.msk.f32.mxu0 %vm2912_vm0, %v2900_v37 }
 0x5af   : > { %v845_v32 = vpop.f32.mrb[2].mxu0 }
 0x5b0   : > { %850 = vst [vmem:[%s270_s17] sm:$0xff] %v845_v32  ;;  %854 = vrot.lane.b32.xlu0 %v845_v32, %s2899_s8  ;;  %v847_v41 = vpop.f32.mrb[3].mxu0 }
 0x5b1   : > { %851 = vst [vmem:[%s270_s17 + $0x8] sm:$0xff] %v847_v41  ;;  %856 = vrot.lane.b32.xlu1 %v847_v41, %s2899_s8  ;;  %s274_s17 = scalar_lea.vmem %s3746_s4, %s3479_s14 }
 0x622   : > { %v855_v33 = vpop.permute.xlu0 %854 }
 0x623   : > { %v857_v38 = vpop.permute.xlu1 %856 }
 0x624   : > { %v858_v40 = vsel %vm363_vm8, %v855_v33, %v857_v38  ;;  %v861_v13 = vsel %vm363_vm8, %v857_v38, %v847_v41  ;;  %vm1103_vm8 = vcmask 392192  }
 0x625   : > { %v862_v9 = vmax.f32 %v845_v32, %v858_v40  ;;  %v863_v19 = vmax.f32 %v847_v41, %v861_v13 }
 0x627   : > { %868 = vrot.lane.b32.xlu1 %v862_v9, %s2901_s18  ;;  %865 = vrot.lane.b32.xlu0 %v862_v9, %s2902_s19 }
 0x62b   : > { %875 = vrot.lane.b32.xlu1 %v863_v19, %s2902_s19  ;;  %871 = vrot.lane.b32.xlu0 %v862_v9, %s2903_s20 }
 0x62f   : > { %881 = vrot.lane.b32.xlu1 %v863_v19, %s2903_s20  ;;  %878 = vrot.lane.b32.xlu0 %v863_v19, %s2901_s18  ;;  %s2916_s18 = smov 12  }
 0x633   : > { %884 = vrot.lane.b32.xlu0 %v862_v9, %s2895_s27 }
 0x699   : > { %v869_v3 = vpop.permute.xlu1 %868  ;;  %v866_v45 = vpop.permute.xlu0 %865 }
 0x69a   : > { %888 = vrot.lane.b32.xlu0 %v869_v3, %s2895_s27  ;;  %886 = vrot.lane.b32.xlu1 %v866_v45, %s2895_s27 }
 0x69d   : > { %v872_v5 = vpop.permute.xlu0 %871  ;;  %v876_v46 = vpop.permute.xlu1 %875 }
 0x69e   : > { %892 = vrot.lane.b32.xlu0 %v863_v19, %s2895_s27  ;;  %890 = vrot.lane.b32.xlu1 %v872_v5, %s2895_s27 }
 0x6a1   : > { %v879_v28 = vpop.permute.xlu0 %878  ;;  %v882_v1 = vpop.permute.xlu1 %881 }
 0x6a2   : > { %894 = vrot.lane.b32.xlu1 %v876_v46, %s2895_s27  ;;  %896 = vrot.lane.b32.xlu0 %v879_v28, %s2895_s27 }
 0x6a5   : > { %v885_v35 = vpop.permute.xlu0 %884 }
 0x6a6   : > { %v909_v36 = vsel %vm908_vm2, %v885_v35, %v862_v9  ;;  %898 = vrot.lane.b32.xlu1 %v882_v1, %s2895_s27 }
 0x6a7   : > { %v917_v47 = vmax.f32 %v862_v9, %v909_v36 }
 0x6a9   : > { %2459 = vmatprep.mubr.msk.f32.mxu1 %vm354_vm7, %v917_v47 }
 0x70c   : > { %v887_v49 = vpop.permute.xlu1 %886  ;;  %v889_v0 = vpop.permute.xlu0 %888 }
 0x70d   : > { %v910_v52 = vsel %vm908_vm2, %v887_v49, %v866_v45  ;;  %v911_v53 = vsel %vm908_vm2, %v889_v0, %v869_v3 }
 0x70e   : > { %v918_v54 = vmax.f32 %v866_v45, %v910_v52  ;;  %v919_v55 = vmax.f32 %v869_v3, %v911_v53 }
 0x710   : > { %v891_v56 = vpop.permute.xlu1 %890  ;;  %2460 = vmatmul.mubr.msk.f32.vlgmr.msra.gmra.mrb[2].mxu1 %vm354_vm7, %v918_v54  ;;  %v893_v57 = vpop.permute.xlu0 %892 }
 0x711   : > { %v912_v58 = vsel %vm908_vm2, %v891_v56, %v872_v5  ;;  %v913_v59 = vsel %vm908_vm2, %v893_v57, %v863_v19  ;;  %2462 = vmatprep.mubr.msk.f32.mxu1 %vm354_vm7, %v919_v55 }
 0x712   : > { %v920_v60 = vmax.f32 %v872_v5, %v912_v58  ;;  %v921_v63 = vmax.f32 %v863_v19, %v913_v59  ;;  %v2350_v19 = vld [vmem:[%s3744_s2 + $0x8] sm:$0xff] }
 0x713   : > { %vm1109_vm10 = vcmp.gt.f32.partialorder %v2350_v19, 0.5 }
 0x714   : > { %v895_v2 = vpop.permute.xlu1 %894  ;;  %2463 = vmatmul.mubr.msk.f32.gmra.mrb[4].mxu1 %vm354_vm7, %v920_v60  ;;  %v897_v62 = vpop.permute.xlu0 %896  ;;  %v1120_v42 = vsel %vm1109_vm10, 1, %v2898_v8  ;;  %vm1374_vm10 = vcmask 523264  }
 0x715   : > { %v914_v4 = vsel %vm908_vm2, %v895_v2, %v876_v46  ;;  %v915_v14 = vsel %vm908_vm2, %v897_v62, %v879_v28  ;;  %2465 = vmatprep.mubr.msk.f32.mxu1 %vm354_vm7, %v921_v63  ;;  %v1124_v29 = vrot.slane %v1120_v42, %v2993_v6  ;;  %v1145_v49 = vrot.slane %v1120_v42, %v3070_v39 }
 0x716   : > { %v922_v15 = vmax.f32 %v876_v46, %v914_v4  ;;  %v923_v51 = vmax.f32 %v879_v28, %v915_v14  ;;  %v1130_v46 = vrot.slane %v1120_v42, %v3003_v12 }
 0x717   : > { %vm3378_vm12 = vcmp.eq.s32.totalorder %v1124_v29, 1 }
 0x718   : > { %v899_v61 = vpop.permute.xlu1 %898  ;;  %2466 = vmatmul.mubr.msk.f32.gmra.mrb[6].mxu1 %vm354_vm7, %v922_v15  ;;  %vm3387_vm15 = vcmp.eq.s32.totalorder %v1130_v46, 1 }
 0x719   : > { %v916_v11 = vsel %vm908_vm2, %v899_v61, %v882_v1  ;;  %2468 = vmatprep.mubr.msk.f32.mxu1 %vm354_vm7, %v923_v51 }
 0x71a   : > { %v924_v34 = vmax.f32 %v882_v1, %v916_v11 }
 0x71c   : > { %2469 = vmatmul.mubr.msk.f32.gmra.mrb[8].mxu1 %vm354_vm7, %v924_v34  ;;  %v1151_v34 = vrot.slane %v1120_v42, %v3096_v7 }
 0x71d   : > { %2489 = vmatprep.mubr.msk.f32.mxu1 %vm2912_vm0, %v2900_v37 }
 0x7e3   : > { %v2461_v17 = vpop.f32.mrb[2].mxu1 }
 0x7e4   : > { %1067 = vrot.lane.b32.xlu0 %v2461_v17, %s2905_s23  ;;  %v1027_v18 = vpop.f32.mrb[3].mxu1 }
 0x7e7   : > { %v2464_v20 = vpop.f32.mrb[4].mxu1 }
 0x7e8   : > { %1075 = vrot.lane.b32.xlu0 %v2464_v20, %s2906_s24  ;;  %v1037_v21 = vpop.f32.mrb[5].mxu1 }
 0x7e9   : > { %1071 = vrot.lane.b32.xlu1 %v1037_v21, %s2897_s29 }
 0x7eb   : > { %v2467_v23 = vpop.f32.mrb[6].mxu1 }
 0x7ec   : > { %1083 = vrot.lane.b32.xlu0 %v2467_v23, %s2907_s25  ;;  %v1047_v24 = vpop.f32.mrb[7].mxu1 }
 0x7ed   : > { %1079 = vrot.lane.b32.xlu1 %v1047_v24, %s2903_s20 }
 0x7ef   : > { %v2470_v48 = vpop.f32.mrb[8].mxu1 }
 0x7f0   : > { %1091 = vrot.lane.b32.xlu0 %v2470_v48, %s2908_s26  ;;  %v1057_v25 = vpop.f32.mrb[9].mxu1  ;;  %v2351_v48 = vld [vmem:[%s3743_s1 + $0x18] sm:$0xff] }
 0x7f1   : > { %1087 = vrot.lane.b32.xlu1 %v1057_v25, %s2909_s30 }
 0x856   : > { %v1068_v26 = vpop.permute.xlu0 %1067 }
 0x857   : > { %v1095_v50 = vsel %vm1094_vm3, %v1027_v18, %v1068_v26 }
 0x85a   : > { %v1076_v27 = vpop.permute.xlu0 %1075 }
 0x85b   : > { %v1072_v16 = vpop.permute.xlu1 %1071 }
 0x85c   : > { %v1096_v30 = vsel %vm354_vm7, %v1095_v50, %v1072_v16 }
 0x85d   : > { %v1098_v32 = vsel %vm1097_vm4, %v1096_v30, %v1076_v27  ;;  %vm3402_vm4 = vcmp.eq.s32.totalorder %v1145_v49, 1 }
 0x85e   : > { %v1084_v31 = vpop.permute.xlu0 %1083 }
 0x85f   : > { %v1080_v10 = vpop.permute.xlu1 %1079 }
 0x860   : > { %v1100_v41 = vsel %vm1099_vm5, %v1098_v32, %v1080_v10  ;;  %vm3420_vm5 = vcmp.eq.s32.totalorder %v1151_v34, 1 }
 0x861   : > { %v1102_v38 = vsel %vm1101_vm6, %v1100_v41, %v1084_v31 }
 0x862   : > { %v1092_v40 = vpop.permute.xlu0 %1091 }
 0x863   : > { %v1088_v33 = vpop.permute.xlu1 %1087 }
 0x864   : > { %v1104_v9 = vsel %vm1103_vm8, %v1102_v38, %v1088_v33 }
 0x865   : > { %v1106_v13 = vsel %vm1105_vm9, %v1104_v9, %v1092_v40 }
 0x866   : > { %1115 = vrot.lane.b32.xlu0 %v1106_v13, %s2895_s27  ;;  %1111 = vrot.lane.b32.xlu1 %v1106_v13, %s2896_s28 }
 0x8d8   : > { %v1116_v3 = vpop.permute.xlu0 %1115  ;;  %v1112_v45 = vpop.permute.xlu1 %1111 }
 0x8d9   : > { %v1119_v5 = vsel %vm1118_vm11, %v1116_v3, %v1106_v13  ;;  %v1114_v28 = vsel %vm293_vm1, %v1106_v13, %v1112_v45 }
 0x8da   : > { %v1126_v1 = vsel %vm3378_vm12, %v1119_v5, %v1114_v28  ;;  %v1132_v47 = vsel %vm3387_vm15, %v1114_v28, %v1119_v5 }
 0x8db   : > { %v2832_v35 = vpack.i.bf16 %v1106_v13, %v1126_v1  ;;  %v2669_v20 = vpack.c.bf16 %v1132_v47, %v1106_v13 }
 0x8dd   : > { %2833 = vrot.lane.b32.xlu0 %v2832_v35, %s2911_s9  ;;  %2828 = vrot.lane.b32.xlu1 %v2832_v35, %s2905_s23 }
 0x8e1   : > { %1169 = vrot.lane.b32.xlu0 %v1132_v47, %s2911_s9  ;;  %1165 = vrot.lane.b32.xlu1 %v1132_v47, %s2905_s23 }
 0x94f   : > { %v2834_v0 = vpop.permute.xlu0 %2833  ;;  %v2829_v52 = vpop.permute.xlu1 %2828 }
 0x950   : > { %v2836_v54 = vunpack.i.h.bf16 %v2834_v0  ;;  %v2835_v55 = vunpack.i.l.bf16 %v2834_v0  ;;  %v2831_v56 = vunpack.i.h.bf16 %v2829_v52  ;;  %v2830_v57 = vunpack.i.l.bf16 %v2829_v52 }
 0x952   : > { %v1161_v58 = vsel %vm1105_vm9, %v2836_v54, %v1106_v13  ;;  %v1141_v59 = vsel %vm1105_vm9, %v2835_v55, %v1126_v1  ;;  %v1157_v60 = vsel %vm1094_vm3, %v1106_v13, %v2831_v56  ;;  %v1137_v63 = vsel %vm1094_vm3, %v1126_v1, %v2830_v57  ;;  %v2353_v57 = vld [vmem:[%s3743_s1 + $0x20] sm:$0xff] }
 0x953   : > { %v1170_v2 = vpop.permute.xlu0 %1169  ;;  %v1166_v62 = vpop.permute.xlu1 %1165  ;;  %v1147_v4 = vsel %vm3402_vm4, %v1141_v59, %v1137_v63  ;;  %v1162_v14 = vsel %vm3402_vm4, %v1161_v58, %v1157_v60  ;;  %v1153_v21 = vsel %vm3420_vm5, %v1137_v63, %v1141_v59  ;;  %v1163_v23 = vsel %vm3420_vm5, %v1157_v60, %v1161_v58 }
 0x954   : > { %v1172_v15 = vsel %vm1105_vm9, %v1170_v2, %v1132_v47  ;;  %v1168_v51 = vsel %vm1094_vm3, %v1132_v47, %v1166_v62  ;;  %v2663_v61 = vpack.c.bf16 %v1162_v14, %v1147_v4  ;;  %v2672_v24 = vpack.c.bf16 %v1163_v23, %v1153_v21 }
 0x955   : > { %v1173_v11 = vsel %vm3402_vm4, %v1172_v15, %v1168_v51  ;;  %v1174_v25 = vsel %vm3420_vm5, %v1168_v51, %v1172_v15  ;;  %v2914_v15 = vmov 1.0  }
 0x956   : > { %2664 = vmatpush3.bf16.msra.mxu1 %v2663_v61  ;;  %v2666_v17 = vpack.c.bf16 %v1126_v1, %v1173_v11 }
 0x957   : > { %2665 = vmatprep.subr.bf16.mxu1 %v2910_v43 }
 0x95a   : > { %2667 = vmatpush3.bf16.msra.mxu1 %v2666_v17 }
 0x95b   : > { %2668 = vmatprep.subr.bf16.mxu1 %v2910_v43 }
 0x95e   : > { %2670 = vmatpush3.bf16.msra.mxu1 %v2669_v20 }
 0x95f   : > { %2671 = vmatprep.subr.bf16.mxu1 %v2910_v43 }
 0x962   : > { %2673 = vmatpush3.bf16.msra.mxu1 %v2672_v24 }
 0x963   : > { %2487 = vmatprep.subr.mxu1 %v2900_v37 }
 0x966   : > { %2488 = vmatpush3.msra.mxu1 %v1174_v25 }
 0x967   : > { %2490 = vmatmul.mubr.msk.f32.vlgmr.msra.gmra.mrb[10].mxu1 %vm451_vm13, %v2351_v48  ;;  %2513 = vmatprep.subr.msk.mxu1 %vm3332_vm14, %v2914_v15 }
 0x968   : > { %2514 = vmatpush3.msk.msra.mxu1 %vm3332_vm14, %v2914_v15 }
 0x969   : > { %2686 = vmatprep.subr.bf16.mxu1 %v2910_v43 }
 0xa3a   : > { %v1246_v26 = vpop.f32.mrb[10].mxu1 }
 0xa3b   : > { %vm1250_vm6 = vcmp.ge.f32.partialorder %v1246_v26, 0.0  ;;  %v1251_v27 = vmul.f32 0.01, %v1246_v26  ;;  %v2491_v50 = vpop.f32.mrb[11].mxu1 }
 0xa3d   : > { %v1252_v16 = vsel %vm1250_vm6, %v1246_v26, %v1251_v27 }
 0xa3e   : > { %1258 = vrot.lane.b32.xlu0 %v1252_v16, %s2895_s27  ;;  %1254 = vrot.lane.b32.xlu1 %v1252_v16, %s2896_s28 }
 0xab0   : > { %v1259_v30 = vpop.permute.xlu0 %1258  ;;  %v1255_v31 = vpop.permute.xlu1 %1254 }
 0xab1   : > { %v1261_v10 = vsel %vm1118_vm11, %v1259_v30, %v1252_v16  ;;  %v1257_v32 = vsel %vm293_vm1, %v1252_v16, %v1255_v31  ;;  %vm1522_vm11 = vcmask 31744  }
 0xab2   : > { %v1262_v41 = vsel %vm3378_vm12, %v1261_v10, %v1257_v32  ;;  %v1263_v38 = vsel %vm3387_vm15, %v1257_v32, %v1261_v10  ;;  %vm1525_vm12 = vcmask 97280  }
 0xab3   : > { %v2842_v33 = vpack.i.bf16 %v1252_v16, %v1262_v41  ;;  %v2681_v54 = vpack.c.bf16 %v1263_v38, %v1252_v16 }
 0xab5   : > { %2843 = vrot.lane.b32.xlu0 %v2842_v33, %s2911_s9  ;;  %2838 = vrot.lane.b32.xlu1 %v2842_v33, %s2905_s23 }
 0xab9   : > { %1290 = vrot.lane.b32.xlu0 %v1263_v38, %s2911_s9  ;;  %1286 = vrot.lane.b32.xlu1 %v1263_v38, %s2905_s23 }
 0xb27   : > { %v2844_v40 = vpop.permute.xlu0 %2843  ;;  %v2839_v9 = vpop.permute.xlu1 %2838 }
 0xb28   : > { %v2846_v13 = vunpack.i.h.bf16 %v2844_v40  ;;  %v2845_v19 = vunpack.i.l.bf16 %v2844_v40  ;;  %v2841_v42 = vunpack.i.h.bf16 %v2839_v9  ;;  %v2840_v29 = vunpack.i.l.bf16 %v2839_v9 }
 0xb2a   : > { %v1282_v22 = vsel %vm1105_vm9, %v2846_v13, %v1252_v16  ;;  %v1272_v3 = vsel %vm1105_vm9, %v2845_v19, %v1262_v41  ;;  %v1278_v45 = vsel %vm1094_vm3, %v1252_v16, %v2841_v42  ;;  %v1268_v5 = vsel %vm1094_vm3, %v1262_v41, %v2840_v29  ;;  %v2360_v13 = vld [vmem:[%s3744_s2 + $0x10] sm:$0xff] }
 0xb2b   : > { %v1291_v46 = vpop.permute.xlu0 %1290  ;;  %v1287_v28 = vpop.permute.xlu1 %1286  ;;  %v1273_v1 = vsel %vm3402_vm4, %v1272_v3, %v1268_v5  ;;  %v1283_v35 = vsel %vm3402_vm4, %v1282_v22, %v1278_v45  ;;  %v1274_v55 = vsel %vm3420_vm5, %v1268_v5, %v1272_v3  ;;  %v1284_v56 = vsel %vm3420_vm5, %v1278_v45, %v1282_v22 }
 0xb2c   : > { %v1293_v36 = vsel %vm1105_vm9, %v1291_v46, %v1263_v38  ;;  %v1289_v47 = vsel %vm1094_vm3, %v1263_v38, %v1287_v28  ;;  %v2675_v49 = vpack.c.bf16 %v1283_v35, %v1273_v1  ;;  %v2684_v53 = vpack.c.bf16 %v1284_v56, %v1274_v55 }
 0xb2d   : > { %v1294_v0 = vsel %vm3402_vm4, %v1293_v36, %v1289_v47  ;;  %v1295_v58 = vsel %vm3420_vm5, %v1289_v47, %v1293_v36  ;;  %vm1529_vm15 = vcmp.gt.f32.partialorder %v2360_v13, 0.5 }
 0xb2e   : > { %2676 = vmatpush3.bf16.msra.mxu0 %v2675_v49  ;;  %v2678_v52 = vpack.c.bf16 %v1262_v41, %v1294_v0  ;;  %v1539_v19 = vsel %vm1529_vm15, 1, %v2898_v8 }
 0xb2f   : > { %2677 = vmatprep.subr.bf16.mxu0 %v2910_v43  ;;  %v1543_v42 = vrot.slane %v1539_v19, %v2993_v6  ;;  %v1549_v5 = vrot.slane %v1539_v19, %v3003_v12  ;;  %v1564_v47 = vrot.slane %v1539_v19, %v3070_v39 }
 0xb31   : > { %vm3516_vm4 = vcmp.eq.s32.totalorder %v1543_v42, 1  ;;  %vm3536_vm5 = vcmp.eq.s32.totalorder %v1564_v47, 1 }
 0xb32   : > { %2679 = vmatpush3.bf16.msra.mxu0 %v2678_v52 }
 0xb33   : > { %2680 = vmatprep.subr.bf16.mxu0 %v2910_v43 }
 0xb36   : > { %2682 = vmatpush3.bf16.msra.mxu0 %v2681_v54 }
 0xb37   : > { %2683 = vmatprep.subr.bf16.mxu0 %v2910_v43 }
 0xb3a   : > { %2685 = vmatpush3.bf16.msra.mxu0 %v2684_v53 }
 0xb3b   : > { %2508 = vmatprep.subr.mxu0 %v2900_v37 }
 0xb3e   : > { %2509 = vmatpush3.msra.mxu0 %v1295_v58 }
 0xb3f   : > { %2511 = vmatmul.mubr.msk.f32.vlgmr.msra.gmra.mrb[4].mxu0 %vm451_vm13, %v2353_v57  ;;  %2698 = vmatprep.subr.bf16.mxu0 %v2910_v43 }
 0xb40   : > { %2560 = vmatprep.mubr.msk.f32.mxu0 %vm2912_vm0, %v2900_v37 }
 0xc12   : > { %v1367_v59 = vpop.f32.mrb[4].mxu0 }
 0xc13   : > { %vm1371_vm8 = vcmp.ge.f32.partialorder %v1367_v59, 0.0  ;;  %v1372_v60 = vmul.f32 0.01, %v1367_v59  ;;  %v2512_v63 = vpop.f32.mrb[5].mxu0 }
 0xc15   : > { %v1373_v2 = vsel %vm1371_vm8, %v1367_v59, %v1372_v60 }
 0xc16   : > { %1377 = vrot.lane.b32.xlu1 %v1373_v2, %s2911_s9  ;;  %1375 = vst.msk [vmem:[%s274_s17] sm:$0xff] %vm1374_vm10, %v1373_v2  ;;  %vm1821_vm10 = vcmask 1043456  }
 0xc88   : > { %v1378_v62 = vpop.permute.xlu1 %1377 }
 0xc89   : > { %v1380_v4 = vsel %vm1105_vm9, %v1378_v62, %v1373_v2  ;;  %vm1404_vm9 = vcmask 56320  }
 0xc8a   : > { %v1381_v14 = vmax.f32 %v1373_v2, %v1380_v4 }
 0xc8c   : > { %1386 = vrot.lane.b32.xlu1 %v1381_v14, %s2902_s19  ;;  %1383 = vrot.lane.b32.xlu0 %v1381_v14, %s2899_s8  ;;  %s2915_s8 = smov 4  }
 0xc90   : > { %1392 = vrot.lane.b32.xlu1 %v1381_v14, %s2895_s27  ;;  %1389 = vrot.lane.b32.xlu0 %v1381_v14, %s2913_s22 }
 0xcfe   : > { %v1387_v51 = vpop.permute.xlu1 %1386  ;;  %v1384_v61 = vpop.permute.xlu0 %1383 }
 0xcff   : > { %1396 = vrot.lane.b32.xlu1 %v1387_v51, %s2895_s27  ;;  %1394 = vrot.lane.b32.xlu0 %v1384_v61, %s2895_s27 }
 0xd02   : > { %v1393_v11 = vpop.permute.xlu1 %1392  ;;  %v1390_v34 = vpop.permute.xlu0 %1389 }
 0xd03   : > { %v1405_v17 = vsel %vm1404_vm9, %v1393_v11, %v1381_v14  ;;  %1398 = vrot.lane.b32.xlu0 %v1390_v34, %s2895_s27  ;;  %v1570_v11 = vrot.slane %v1539_v19, %v3096_v7 }
 0xd04   : > { %v1409_v18 = vmax.f32 %v1381_v14, %v1405_v17 }
 0xd05   : > { %vm3554_vm6 = vcmp.eq.s32.totalorder %v1570_v11, 1 }
 0xd06   : > { %2515 = vmatprep.mubr.msk.f32.mxu1 %vm1094_vm3, %v1409_v18 }
 0xd71   : > { %v1397_v20 = vpop.permute.xlu1 %1396  ;;  %v1395_v21 = vpop.permute.xlu0 %1394 }
 0xd72   : > { %v1407_v23 = vsel %vm1404_vm9, %v1397_v20, %v1387_v51  ;;  %v1406_v24 = vsel %vm1404_vm9, %v1395_v21, %v1384_v61 }
 0xd73   : > { %v1411_v48 = vmax.f32 %v1387_v51, %v1407_v23  ;;  %v1410_v25 = vmax.f32 %v1384_v61, %v1406_v24  ;;  %v2361_v24 = vld [vmem:[%s3743_s1 + $0x28] sm:$0xff] }
 0xd75   : > { %2516 = vmatmul.mubr.msk.f32.vlgmr.msra.gmra.mrb[12].mxu1 %vm1094_vm3, %v1410_v25  ;;  %v1399_v26 = vpop.permute.xlu0 %1398 }
 0xd76   : > { %v1408_v27 = vsel %vm1404_vm9, %v1399_v26, %v1390_v34  ;;  %2518 = vmatprep.mubr.msk.f32.mxu1 %vm1094_vm3, %v1411_v48  ;;  %vm1810_vm9 = vcmask 23552  }
 0xd77   : > { %v1412_v50 = vmax.f32 %v1390_v34, %v1408_v27 }
 0xd79   : > { %2519 = vmatmul.mubr.msk.f32.gmra.mrb[14].mxu1 %vm1094_vm3, %v1412_v50 }
 0xd7a   : > { %2539 = vmatprep.mubr.msk.f32.mxu1 %vm2912_vm0, %v2900_v37 }
 0xe48   : > { %v2517_v16 = vpop.f32.mrb[12].mxu1 }
 0xe49   : > { %1511 = vrot.lane.b32.xlu1 %v2517_v16, %s2915_s8  ;;  %v1491_v30 = vpop.f32.mrb[13].mxu1 }
 0xe4c   : > { %v2520_v31 = vpop.f32.mrb[14].mxu1 }
 0xe4d   : > { %1519 = vrot.lane.b32.xlu1 %v2520_v31, %s2916_s18  ;;  %v1501_v10 = vpop.f32.mrb[15].mxu1 }
 0xe4e   : > { %1515 = vrot.lane.b32.xlu0 %v1501_v10, %s2905_s23  ;;  %s2917_s23 = smov 124  }
 0xebb   : > { %v1512_v32 = vpop.permute.xlu1 %1511 }
 0xebc   : > { %v1523_v41 = vsel %vm1522_vm11, %v1491_v30, %v1512_v32 }
 0xebf   : > { %v1520_v38 = vpop.permute.xlu1 %1519 }
 0xec0   : > { %v1516_v33 = vpop.permute.xlu0 %1515 }
 0xec1   : > { %v1524_v40 = vsel %vm1094_vm3, %v1523_v41, %v1516_v33  ;;  %vm3525_vm3 = vcmp.eq.s32.totalorder %v1549_v5, 1 }
 0xec2   : > { %v1526_v9 = vsel %vm1525_vm12, %v1524_v40, %v1520_v38 }
 0xec3   : > { %1535 = vrot.lane.b32.xlu1 %v1526_v9, %s2895_s27  ;;  %1531 = vrot.lane.b32.xlu0 %v1526_v9, %s2896_s28 }
 0xf35   : > { %v1536_v22 = vpop.permute.xlu1 %1535  ;;  %v1532_v3 = vpop.permute.xlu0 %1531 }
 0xf36   : > { %v1538_v45 = vsel %vm908_vm2, %v1536_v22, %v1526_v9  ;;  %v1534_v46 = vsel %vm293_vm1, %v1526_v9, %v1532_v3 }
 0xf37   : > { %v1545_v28 = vsel %vm3516_vm4, %v1538_v45, %v1534_v46  ;;  %v1551_v36 = vsel %vm3525_vm3, %v1534_v46, %v1538_v45 }
 0xf38   : > { %v2852_v1 = vpack.i.bf16 %v1526_v9, %v1545_v28  ;;  %v2693_v18 = vpack.c.bf16 %v1551_v36, %v1526_v9 }
 0xf3a   : > { %2853 = vrot.lane.b32.xlu1 %v2852_v1, %s2917_s23  ;;  %2848 = vrot.lane.b32.xlu0 %v2852_v1, %s2915_s8 }
 0xf3e   : > { %1588 = vrot.lane.b32.xlu1 %v1551_v36, %s2917_s23  ;;  %1584 = vrot.lane.b32.xlu0 %v1551_v36, %s2915_s8 }
 0xfac   : > { %v2854_v49 = vpop.permute.xlu1 %2853  ;;  %v2849_v0 = vpop.permute.xlu0 %2848 }
 0xfad   : > { %v2856_v54 = vunpack.i.h.bf16 %v2854_v49  ;;  %v2855_v55 = vunpack.i.l.bf16 %v2854_v49  ;;  %v2851_v56 = vunpack.i.h.bf16 %v2849_v0  ;;  %v2850_v53 = vunpack.i.l.bf16 %v2849_v0 }
 0xfaf   : > { %v1580_v57 = vsel %vm1525_vm12, %v2856_v54, %v1526_v9  ;;  %v1560_v58 = vsel %vm1525_vm12, %v2855_v55, %v1545_v28  ;;  %v1576_v59 = vsel %vm1522_vm11, %v1526_v9, %v2851_v56  ;;  %v1556_v60 = vsel %vm1522_vm11, %v1545_v28, %v2850_v53  ;;  %v2363_v53 = vld [vmem:[%s3743_s1 + $0x30] sm:$0xff] }
 0xfb0   : > { %v1589_v63 = vpop.permute.xlu1 %1588  ;;  %v1585_v2 = vpop.permute.xlu0 %1584  ;;  %v1566_v62 = vsel %vm3536_vm5, %v1560_v58, %v1556_v60  ;;  %v1581_v4 = vsel %vm3536_vm5, %v1580_v57, %v1576_v59  ;;  %v1572_v20 = vsel %vm3554_vm6, %v1556_v60, %v1560_v58  ;;  %v1582_v21 = vsel %vm3554_vm6, %v1576_v59, %v1580_v57 }
 0xfb1   : > { %v1591_v14 = vsel %vm1525_vm12, %v1589_v63, %v1551_v36  ;;  %v1587_v15 = vsel %vm1522_vm11, %v1551_v36, %v1585_v2  ;;  %v2687_v51 = vpack.c.bf16 %v1581_v4, %v1566_v62  ;;  %v2696_v23 = vpack.c.bf16 %v1582_v21, %v1572_v20 }
 0xfb2   : > { %v1592_v61 = vsel %vm3536_vm5, %v1591_v14, %v1587_v15  ;;  %v1593_v48 = vsel %vm3554_vm6, %v1587_v15, %v1591_v14  ;;  %v2338_v14 = vsel %vm3332_vm14, 1.0, %v2900_v37 }
 0xfb3   : > { %2688 = vmatpush3.bf16.msra.mxu1 %v2687_v51  ;;  %v2690_v34 = vpack.c.bf16 %v1545_v28, %v1592_v61 }
 0xfb4   : > { %2689 = vmatprep.subr.bf16.mxu1 %v2910_v43 }
 0xfb7   : > { %2691 = vmatpush3.bf16.msra.mxu1 %v2690_v34 }
 0xfb8   : > { %2692 = vmatprep.subr.bf16.mxu1 %v2910_v43 }
 0xfbb   : > { %2694 = vmatpush3.bf16.msra.mxu1 %v2693_v18 }
 0xfbc   : > { %2695 = vmatprep.subr.bf16.mxu1 %v2910_v43 }
 0xfbf   : > { %2697 = vmatpush3.bf16.msra.mxu1 %v2696_v23 }
 0xfc0   : > { %2537 = vmatprep.subr.mxu1 %v2900_v37 }
 0xfc3   : > { %2538 = vmatpush3.msra.mxu1 %v1593_v48 }
 0xfc4   : > { %2540 = vmatmul.mubr.msk.f32.vlgmr.msra.gmra.mrb[16].mxu1 %vm451_vm13, %v2361_v24  ;;  %2563 = vmatprep.subr.msk.mxu1 %vm1821_vm10, %v2338_v14  ;;  %v2368_v24 = vld [vmem:[%s3744_s2 + $0x18] sm:$0xff] }
 0xfc5   : > { %2564 = vmatpush3.msk.msra.mxu1 %vm1821_vm10, %v2338_v14  ;;  %vm1908_vm14 = vcmp.gt.f32.partialorder %v2368_v24, 0.5 }
 0xfc6   : > { %2710 = vmatprep.subr.bf16.mxu1 %v2910_v43  ;;  %v1918_v48 = vsel %vm1908_vm14, 1, %v2898_v8 }
0x1097   : > { %v1665_v25 = vpop.f32.mrb[16].mxu1 }
0x1098   : > { %vm1669_vm8 = vcmp.ge.f32.partialorder %v1665_v25, 0.0  ;;  %v1670_v26 = vmul.f32 0.01, %v1665_v25  ;;  %v2541_v27 = vpop.f32.mrb[17].mxu1 }
0x109a   : > { %v1671_v50 = vsel %vm1669_vm8, %v1665_v25, %v1670_v26  ;;  %v1922_v25 = vrot.slane %v1918_v48, %v2993_v6 }
0x109b   : > { %1677 = vrot.lane.b32.xlu1 %v1671_v50, %s2895_s27  ;;  %1673 = vrot.lane.b32.xlu0 %v1671_v50, %s2896_s28 }
0x110d   : > { %v1678_v16 = vpop.permute.xlu1 %1677  ;;  %v1674_v30 = vpop.permute.xlu0 %1673 }
0x110e   : > { %v1680_v31 = vsel %vm908_vm2, %v1678_v16, %v1671_v50  ;;  %v1676_v10 = vsel %vm293_vm1, %v1671_v50, %v1674_v30  ;;  %v1928_v30 = vrot.slane %v1918_v48, %v3003_v12  ;;  %v1943_v12 = vrot.slane %v1918_v48, %v3070_v39 }
0x110f   : > { %v1681_v32 = vsel %vm3516_vm4, %v1680_v31, %v1676_v10  ;;  %v1682_v33 = vsel %vm3525_vm3, %v1676_v10, %v1680_v31 }
0x1110   : > { %v2862_v41 = vpack.i.bf16 %v1671_v50, %v1681_v32  ;;  %v2705_v54 = vpack.c.bf16 %v1682_v33, %v1671_v50  ;;  %vm3661_vm15 = vcmp.eq.s32.totalorder %v1943_v12, 1 }
0x1112   : > { %2863 = vrot.lane.b32.xlu1 %v2862_v41, %s2917_s23  ;;  %2858 = vrot.lane.b32.xlu0 %v2862_v41, %s2915_s8 }
0x1116   : > { %1709 = vrot.lane.b32.xlu1 %v1682_v33, %s2917_s23  ;;  %1705 = vrot.lane.b32.xlu0 %v1682_v33, %s2915_s8  ;;  %s282_s8 = scalar_lea.vmem %s3748_s6, %s3479_s14 }
0x1184   : > { %v2864_v38 = vpop.permute.xlu1 %2863  ;;  %v2859_v40 = vpop.permute.xlu0 %2858 }
0x1185   : > { %v2866_v9 = vunpack.i.h.bf16 %v2864_v38  ;;  %v2865_v13 = vunpack.i.l.bf16 %v2864_v38  ;;  %v2861_v19 = vunpack.i.h.bf16 %v2859_v40  ;;  %v2860_v42 = vunpack.i.l.bf16 %v2859_v40 }
0x1187   : > { %v1701_v29 = vsel %vm1525_vm12, %v2866_v9, %v1671_v50  ;;  %v1691_v22 = vsel %vm1525_vm12, %v2865_v13, %v1681_v32  ;;  %v1697_v3 = vsel %vm1522_vm11, %v1671_v50, %v2861_v19  ;;  %v1687_v45 = vsel %vm1522_vm11, %v1681_v32, %v2860_v42 }
0x1188   : > { %v1710_v5 = vpop.permute.xlu1 %1709  ;;  %v1706_v46 = vpop.permute.xlu0 %1705  ;;  %v1692_v28 = vsel %vm3536_vm5, %v1691_v22, %v1687_v45  ;;  %v1702_v1 = vsel %vm3536_vm5, %v1701_v29, %v1697_v3  ;;  %v1693_v55 = vsel %vm3554_vm6, %v1687_v45, %v1691_v22  ;;  %v1703_v56 = vsel %vm3554_vm6, %v1697_v3, %v1701_v29 }
0x1189   : > { %v1712_v35 = vsel %vm1525_vm12, %v1710_v5, %v1682_v33  ;;  %v1708_v36 = vsel %vm1522_vm11, %v1682_v33, %v1706_v46  ;;  %v2699_v47 = vpack.c.bf16 %v1702_v1, %v1692_v28  ;;  %v2708_v52 = vpack.c.bf16 %v1703_v56, %v1693_v55 }
0x118a   : > { %v1713_v49 = vsel %vm3536_vm5, %v1712_v35, %v1708_v36  ;;  %v1714_v57 = vsel %vm3554_vm6, %v1708_v36, %v1712_v35 }
0x118b   : > { %2700 = vmatpush3.bf16.msra.mxu0 %v2699_v47  ;;  %v2702_v0 = vpack.c.bf16 %v1681_v32, %v1713_v49  ;;  %v1949_v47 = vrot.slane %v1918_v48, %v3096_v7 }
0x118c   : > { %2701 = vmatprep.subr.bf16.mxu0 %v2910_v43 }
0x118d   : > { %vm3679_vm4 = vcmp.eq.s32.totalorder %v1949_v47, 1 }
0x118f   : > { %2703 = vmatpush3.bf16.msra.mxu0 %v2702_v0 }
0x1190   : > { %2704 = vmatprep.subr.bf16.mxu0 %v2910_v43 }
0x1193   : > { %2706 = vmatpush3.bf16.msra.mxu0 %v2705_v54 }
0x1194   : > { %2707 = vmatprep.subr.bf16.mxu0 %v2910_v43 }
0x1197   : > { %2709 = vmatpush3.bf16.msra.mxu0 %v2708_v52  ;;  %v2369_v52 = vld [vmem:[%s3743_s1 + $0x38] sm:$0xff] }
0x1198   : > { %2558 = vmatprep.subr.mxu0 %v2900_v37 }
0x119b   : > { %2559 = vmatpush3.msra.mxu0 %v1714_v57 }
0x119c   : > { %2561 = vmatmul.mubr.msk.f32.vlgmr.msra.gmra.mrb[6].mxu0 %vm451_vm13, %v2363_v53  ;;  %2722 = vmatprep.subr.bf16.mxu0 %v2910_v43 }
0x119d   : > { %2607 = vmatprep.mubr.msk.f32.mxu0 %vm2912_vm0, %v2900_v37 }
0x126f   : > { %v1786_v58 = vpop.f32.mrb[6].mxu0 }
0x1270   : > { %vm1790_vm2 = vcmp.ge.f32.partialorder %v1786_v58, 0.0  ;;  %v1791_v59 = vmul.f32 0.01, %v1786_v58  ;;  %v2562_v60 = vpop.f32.mrb[7].mxu0 }
0x1272   : > { %v1792_v63 = vsel %vm1790_vm2, %v1786_v58, %v1791_v59 }
0x1273   : > { %1795 = vrot.lane.b32.xlu0 %v1792_v63, %s2917_s23  ;;  %1793 = vst.msk [vmem:[%s278_s10] sm:$0xff] %vm354_vm7, %v1792_v63  ;;  %vm1904_vm7 = vcmask 15360  }
0x12e5   : > { %v1796_v2 = vpop.permute.xlu0 %1795 }
0x12e6   : > { %v1798_v62 = vsel %vm1525_vm12, %v1796_v2, %v1792_v63  ;;  %vm3650_vm12 = vcmp.eq.s32.totalorder %v1928_v30, 1 }
0x12e7   : > { %v1799_v4 = vmax.f32 %v1792_v63, %v1798_v62 }
0x12e9   : > { %1804 = vrot.lane.b32.xlu0 %v1799_v4, %s2895_s27  ;;  %1801 = vrot.lane.b32.xlu1 %v1799_v4, %s2911_s9  ;;  %s2918_s9 = smov 2  }
0x135b   : > { %v1805_v15 = vpop.permute.xlu0 %1804  ;;  %v1802_v51 = vpop.permute.xlu1 %1801 }
0x135c   : > { %v1811_v61 = vsel %vm1810_vm9, %v1805_v15, %v1799_v4  ;;  %1806 = vrot.lane.b32.xlu1 %v1802_v51, %s2895_s27 }
0x135d   : > { %v1813_v11 = vmax.f32 %v1799_v4, %v1811_v61 }
0x135f   : > { %2565 = vmatprep.mubr.msk.f32.mxu1 %vm1522_vm11, %v1813_v11 }
0x13ce   : > { %v1807_v34 = vpop.permute.xlu1 %1806 }
0x13cf   : > { %v1812_v17 = vsel %vm1810_vm9, %v1807_v34, %v1802_v51 }
0x13d0   : > { %v1814_v44 = vmax.f32 %v1802_v51, %v1812_v17 }
0x13d2   : > { %2566 = vmatmul.mubr.msk.f32.vlgmr.msra.gmra.mrb[18].mxu1 %vm1522_vm11, %v1814_v44 }
0x13d3   : > { %2586 = vmatprep.mubr.msk.f32.mxu1 %vm2912_vm0, %v2900_v37  ;;  %vm3641_vm0 = vcmp.eq.s32.totalorder %v1922_v25, 1 }
0x14a5   : > { %v2567_v18 = vpop.f32.mrb[18].mxu1 }
0x14a6   : > { %1901 = vrot.lane.b32.xlu0 %v2567_v18, %s2918_s9  ;;  %v1891_v20 = vpop.f32.mrb[19].mxu1 }
0x1518   : > { %v1902_v21 = vpop.permute.xlu0 %1901 }
0x1519   : > { %v1905_v23 = vsel %vm1904_vm7, %v1891_v20, %v1902_v21 }
0x151a   : > { %1914 = vrot.lane.b32.xlu0 %v1905_v23, %s2895_s27  ;;  %1910 = vrot.lane.b32.xlu1 %v1905_v23, %s2896_s28 }
0x158c   : > { %v1915_v27 = vpop.permute.xlu0 %1914  ;;  %v1911_v50 = vpop.permute.xlu1 %1910 }
0x158d   : > { %v1917_v16 = vsel %vm1810_vm9, %v1915_v27, %v1905_v23  ;;  %v1913_v31 = vsel %vm293_vm1, %v1905_v23, %v1911_v50 }
0x158e   : > { %v1924_v10 = vsel %vm3641_vm0, %v1917_v16, %v1913_v31  ;;  %v1930_v6 = vsel %vm3650_vm12, %v1913_v31, %v1917_v16 }
0x158f   : > { %v2872_v32 = vpack.i.bf16 %v1905_v23, %v1924_v10  ;;  %v2717_v54 = vpack.c.bf16 %v1930_v6, %v1905_v23 }
0x1591   : > { %2873 = vrot.lane.b32.xlu0 %v2872_v32, %s2919_s13  ;;  %2868 = vrot.lane.b32.xlu1 %v2872_v32, %s2918_s9 }
0x1595   : > { %1967 = vrot.lane.b32.xlu0 %v1930_v6, %s2919_s13  ;;  %1963 = vrot.lane.b32.xlu1 %v1930_v6, %s2918_s9 }
0x1603   : > { %v2874_v41 = vpop.permute.xlu0 %2873  ;;  %v2869_v33 = vpop.permute.xlu1 %2868 }
0x1604   : > { %v2876_v40 = vunpack.i.h.bf16 %v2874_v41  ;;  %v2875_v9 = vunpack.i.l.bf16 %v2874_v41  ;;  %v2871_v13 = vunpack.i.h.bf16 %v2869_v33  ;;  %v2870_v19 = vunpack.i.l.bf16 %v2869_v33  ;;  %v2371_v41 = vld [vmem:[%s3743_s1 + $0x40] sm:$0xff] }
0x1606   : > { %v1959_v42 = vsel %vm1904_vm7, %v2876_v40, %v1905_v23  ;;  %v1939_v29 = vsel %vm1904_vm7, %v2875_v9, %v1924_v10  ;;  %v1955_v22 = vsel %vm1904_vm7, %v1905_v23, %v2871_v13  ;;  %v1935_v3 = vsel %vm1904_vm7, %v1924_v10, %v2870_v19 }
0x1607   : > { %v1968_v45 = vpop.permute.xlu0 %1967  ;;  %v1964_v39 = vpop.permute.xlu1 %1963  ;;  %v1945_v5 = vsel %vm3661_vm15, %v1939_v29, %v1935_v3  ;;  %v1960_v46 = vsel %vm3661_vm15, %v1959_v42, %v1955_v22  ;;  %v1951_v55 = vsel %vm3679_vm4, %v1935_v3, %v1939_v29  ;;  %v1961_v56 = vsel %vm3679_vm4, %v1955_v22, %v1959_v42 }
0x1608   : > { %v1970_v28 = vsel %vm1904_vm7, %v1968_v45, %v1930_v6  ;;  %v1966_v1 = vsel %vm1904_vm7, %v1930_v6, %v1964_v39  ;;  %v2711_v35 = vpack.c.bf16 %v1960_v46, %v1945_v5  ;;  %v2720_v7 = vpack.c.bf16 %v1961_v56, %v1951_v55 }
0x1609   : > { %v1971_v36 = vsel %vm3661_vm15, %v1970_v28, %v1966_v1  ;;  %v1972_v53 = vsel %vm3679_vm4, %v1966_v1, %v1970_v28 }
0x160a   : > { %2712 = vmatpush3.bf16.msra.mxu1 %v2711_v35  ;;  %v2714_v49 = vpack.c.bf16 %v1924_v10, %v1971_v36 }
0x160b   : > { %2713 = vmatprep.subr.bf16.mxu1 %v2910_v43 }
0x160e   : > { %2715 = vmatpush3.bf16.msra.mxu1 %v2714_v49 }
0x160f   : > { %2716 = vmatprep.subr.bf16.mxu1 %v2910_v43 }
0x1612   : > { %2718 = vmatpush3.bf16.msra.mxu1 %v2717_v54 }
0x1613   : > { %2719 = vmatprep.subr.bf16.mxu1 %v2910_v43 }
0x1616   : > { %2721 = vmatpush3.bf16.msra.mxu1 %v2720_v7 }
0x1617   : > { %2584 = vmatprep.subr.mxu1 %v2900_v37 }
0x161a   : > { %2585 = vmatpush3.msra.mxu1 %v1972_v53 }
0x161b   : > { %2587 = vmatmul.mubr.msk.f32.vlgmr.msra.gmra.mrb[20].mxu1 %vm451_vm13, %v2369_v52 }
0x16ee   : > { %v2044_v57 = vpop.f32.mrb[20].mxu1 }
0x16ef   : > { %vm2048_vm3 = vcmp.ge.f32.partialorder %v2044_v57, 0.0  ;;  %v2049_v58 = vmul.f32 0.01, %v2044_v57  ;;  %v2588_v59 = vpop.f32.mrb[21].mxu1 }
0x16f1   : > { %v2050_v60 = vsel %vm2048_vm3, %v2044_v57, %v2049_v58 }
0x16f2   : > { %2056 = vrot.lane.b32.xlu0 %v2050_v60, %s2895_s27  ;;  %2052 = vrot.lane.b32.xlu1 %v2050_v60, %s2896_s28 }
0x1764   : > { %v2057_v63 = vpop.permute.xlu0 %2056  ;;  %v2053_v2 = vpop.permute.xlu1 %2052 }
0x1765   : > { %v2059_v62 = vsel %vm1810_vm9, %v2057_v63, %v2050_v60  ;;  %v2055_v4 = vsel %vm293_vm1, %v2050_v60, %v2053_v2 }
0x1766   : > { %v2060_v14 = vsel %vm3641_vm0, %v2059_v62, %v2055_v4  ;;  %v2061_v51 = vsel %vm3650_vm12, %v2055_v4, %v2059_v62 }
0x1767   : > { %v2882_v15 = vpack.i.bf16 %v2050_v60, %v2060_v14  ;;  %v2729_v32 = vpack.c.bf16 %v2061_v51, %v2050_v60 }
0x1769   : > { %2883 = vrot.lane.b32.xlu0 %v2882_v15, %s2919_s13  ;;  %2878 = vrot.lane.b32.xlu1 %v2882_v15, %s2918_s9 }
0x176d   : > { %2088 = vrot.lane.b32.xlu0 %v2061_v51, %s2919_s13  ;;  %2084 = vrot.lane.b32.xlu1 %v2061_v51, %s2918_s9 }
0x17db   : > { %v2884_v61 = vpop.permute.xlu0 %2883  ;;  %v2879_v11 = vpop.permute.xlu1 %2878 }
0x17dc   : > { %v2886_v34 = vunpack.i.h.bf16 %v2884_v61  ;;  %v2885_v17 = vunpack.i.l.bf16 %v2884_v61  ;;  %v2881_v44 = vunpack.i.h.bf16 %v2879_v11  ;;  %v2880_v18 = vunpack.i.l.bf16 %v2879_v11 }
0x17de   : > { %v2080_v20 = vsel %vm1904_vm7, %v2886_v34, %v2050_v60  ;;  %v2070_v21 = vsel %vm1904_vm7, %v2885_v17, %v2060_v14  ;;  %v2076_v23 = vsel %vm1904_vm7, %v2050_v60, %v2881_v44  ;;  %v2066_v24 = vsel %vm1904_vm7, %v2060_v14, %v2880_v18 }
0x17df   : > { %v2089_v48 = vpop.permute.xlu0 %2088  ;;  %v2085_v25 = vpop.permute.xlu1 %2084  ;;  %v2071_v26 = vsel %vm3661_vm15, %v2070_v21, %v2066_v24  ;;  %v2081_v27 = vsel %vm3661_vm15, %v2080_v20, %v2076_v23  ;;  %v2072_v8 = vsel %vm3679_vm4, %v2066_v24, %v2070_v21  ;;  %v2082_v6 = vsel %vm3679_vm4, %v2076_v23, %v2080_v20 }
0x17e0   : > { %v2091_v50 = vsel %vm1904_vm7, %v2089_v48, %v2061_v51  ;;  %v2087_v16 = vsel %vm1904_vm7, %v2061_v51, %v2085_v25  ;;  %v2723_v30 = vpack.c.bf16 %v2081_v27, %v2071_v26  ;;  %v2732_v12 = vpack.c.bf16 %v2082_v6, %v2072_v8 }
0x17e1   : > { %v2092_v31 = vsel %vm3661_vm15, %v2091_v50, %v2087_v16  ;;  %v2093_v33 = vsel %vm3679_vm4, %v2087_v16, %v2091_v50 }
0x17e2   : > { %2724 = vmatpush3.bf16.msra.mxu0 %v2723_v30  ;;  %v2726_v10 = vpack.c.bf16 %v2060_v14, %v2092_v31 }
0x17e3   : > { %2725 = vmatprep.subr.bf16.mxu0 %v2910_v43 }
0x17e6   : > { %2727 = vmatpush3.bf16.msra.mxu0 %v2726_v10 }
0x17e7   : > { %2728 = vmatprep.subr.bf16.mxu0 %v2910_v43 }
0x17ea   : > { %2730 = vmatpush3.bf16.msra.mxu0 %v2729_v32 }
0x17eb   : > { %2731 = vmatprep.subr.bf16.mxu0 %v2910_v43 }
0x17ee   : > { %2733 = vmatpush3.bf16.msra.mxu0 %v2732_v12 }
0x17ef   : > { %2605 = vmatprep.subr.mxu0 %v2900_v37 }
0x17f2   : > { %2606 = vmatpush3.msra.mxu0 %v2093_v33 }
0x17f3   : > { %2608 = vmatmul.mubr.msk.f32.vlgmr.msra.gmra.mrb[8].mxu0 %vm451_vm13, %v2371_v41 }
0x18c6   : > { %v2165_v38 = vpop.f32.mrb[8].mxu0 }
0x18c7   : > { %vm2169_vm1 = vcmp.ge.f32.partialorder %v2165_v38, 0.0  ;;  %v2170_v43 = vmul.f32 0.01, %v2165_v38  ;;  %v2609_v40 = vpop.f32.mrb[9].mxu0 }
0x18c9   : > { %v2171_v9 = vsel %vm2169_vm1, %v2165_v38, %v2170_v43 }
0x18ca   : > { %2172 = vst.msk [vmem:[%s282_s8] sm:$0xff] %vm1522_vm11, %v2171_v9 }
0x18cb PF: > { %s17_s21 = sadd.s32 1, %s2893_s21  }
0x18cc   : > { %p14_p4 = scmp.ge.s32.totalorder %s17_s21, 4  }
0x18ce   :  { %16 = sbr.rel (!%p14_p4) target bundleno = 1 (0x1), region = 109 }

</bundles_post_ra>
